<compile_context>
chip_gen: v7x
topology: tpu7x:2x2x1
jax: 0.10.0
libtpu: 0.0.40
codegen_flags: <defaults>
</compile_context>

<pallas_src>
import functools

import jax
import jax.numpy as jnp
from jax.experimental import pallas as pl
from jax.experimental.pallas import tpu as pltpu


# ----------------------------------------------------------------------------
# Pallas kernel: one EncoderLayer step for a block of Bblk batch elements.
# Grid = (batch_block, layer); the output block doubles as the VMEM-resident
# carry of the activations across the layer axis.
# ----------------------------------------------------------------------------
def encoder_kernel(bias_ref, x_ref,
                   wq_ref, bq_ref, wk_ref, bk_ref, wv_ref, bv_ref,
                   wo_ref, bo_ref, g_ref, beta_ref,
                   w1_ref, b1_ref, w2_ref, b2_ref,
                   out_ref, ctx_ref, *, n_heads, head_dim, block_b, seq_len):
    layer = pl.program_id(1)

    # Initialize the VMEM-resident carry from the embedded input at layer 0.
    @pl.when(layer == 0)
    def _():
        out_ref[...] = x_ref[...]

    x = out_ref[...]                                  # (Bblk*S, H) f32 residual stream
    x_bf = x.astype(jnp.bfloat16)
    inv_scale = 1.0 / (head_dim ** 0.5)

    # --- QKV projections on the whole batch block (bf16 MXU, f32 accum) ---
    q = (jnp.dot(x_bf, wq_ref[0], preferred_element_type=jnp.float32)
         + bq_ref[0]) * inv_scale                     # scale folded into q
    k = jnp.dot(x_bf, wk_ref[0], preferred_element_type=jnp.float32) + bk_ref[0]
    v = jnp.dot(x_bf, wv_ref[0], preferred_element_type=jnp.float32) + bv_ref[0]

    bias = bias_ref[...]                              # (Bblk, 1, S) additive mask bias

    # --- per-(head, sequence) attention; ctx goes straight into the bf16
    #     scratch (implicit head-concat) so per-iteration intermediates die
    #     immediately and no accumulator chain is kept live. ---
    for h in range(n_heads):
        lo, hi = h * head_dim, (h + 1) * head_dim
        for b in range(block_b):
            r0, r1 = b * seq_len, (b + 1) * seq_len
            qh = q[r0:r1, lo:hi].astype(jnp.bfloat16)          # (S, hd)
            kh = k[r0:r1, lo:hi].astype(jnp.bfloat16)          # (S, hd)
            vh = v[r0:r1, lo:hi].astype(jnp.bfloat16)          # (S, hd)

            # q @ k^T without an explicit transpose (contract on head_dim).
            energy = jax.lax.dot_general(
                qh, kh, (((1,), (1,)), ((), ())),
                preferred_element_type=jnp.float32) + bias[b]  # (S, S) f32

            m = jnp.max(energy, axis=-1, keepdims=True)
            p = jnp.exp(energy - m)
            attn = p * pl.reciprocal(jnp.sum(p, axis=-1, keepdims=True),
                                     approx=True)

            ctx = jnp.dot(attn.astype(jnp.bfloat16), vh,
                          preferred_element_type=jnp.float32)  # (S, hd)
            ctx_ref[r0:r1, lo:hi] = ctx.astype(jnp.bfloat16)

    # --- single K=H output projection over the whole block (fc_o) ---
    attn_out = jnp.dot(ctx_ref[...], wo_ref[0],
                       preferred_element_type=jnp.float32) + bo_ref[0]

    g, beta = g_ref[0], beta_ref[0]

    def layer_norm(z):                                # f32 LayerNorm, eps = 1e-5
        mu = jnp.mean(z, axis=-1, keepdims=True)
        var = jnp.mean(jnp.square(z - mu), axis=-1, keepdims=True)
        return (z - mu) * jax.lax.rsqrt(var + 1e-5) * g + beta

    y = layer_norm(x + attn_out)

    # --- position-wise feed-forward (bf16 MXU, f32 accum) ---
    h1 = jnp.maximum(
        jnp.dot(y.astype(jnp.bfloat16), w1_ref[0],
                preferred_element_type=jnp.float32) + b1_ref[0], 0.0)
    ff = jnp.dot(h1.astype(jnp.bfloat16), w2_ref[0],
                 preferred_element_type=jnp.float32) + b2_ref[0]

    out_ref[...] = layer_norm(y + ff)                 # carry for the next layer


# ----------------------------------------------------------------------------
# Wrapper: whole encoder stack in a single pallas_call.
# ----------------------------------------------------------------------------
@functools.partial(jax.jit, static_argnames=("pad_idx", "n_heads", "block_batch"))
def encoder_forward(src, params, *, pad_idx, n_heads, block_batch=None):
    B, S = src.shape
    token_emb = params["token_emb"]
    H = token_emb.shape[1]
    head_dim = H // n_heads
    layers = params["layers"]
    L = len(layers)
    P = layers[0]["w1"].shape[1]

    # Choose the batch block: largest divisor of B (<= 8) that still leaves the
    # parallel (batch) grid axis >= 2 when possible (megacore on v7x).
    if block_batch is None:
        cands = [d for d in range(1, B + 1) if B % d == 0 and d <= 8]
        pref = [d for d in cands if B // d >= 2]
        block_batch = max(pref) if pref else max(cands)
    assert B % block_batch == 0, (B, block_batch)
    Bb = block_batch

    # Embedding gather + scaling (glue) in plain JAX; flatten to (B*S, H) so
    # the kernel works on lane-dense 2-D slabs (no in-kernel reshapes).
    # NOTE: for real configs pad H, P to multiples of 128 and S to a multiple
    # of 8 before calling the kernel (demo shapes are intentionally tiny).
    x = (token_emb[src] * jnp.sqrt(jnp.float32(H))
         + params["pos_emb"][jnp.arange(S)][None, :, :]).astype(jnp.float32)
    x = x.reshape(B * S, H)                                                # (B*S, H)

    # Additive mask bias: 0 where valid token, -1e10 where pad.
    bias = jnp.where(src != pad_idx, 0.0, -1e10).astype(jnp.float32)[:, None, :]  # (B,1,S)

    def stack(name, dtype):
        return jnp.stack([lp[name] for lp in layers]).astype(dtype)

    wq = stack("wq", jnp.bfloat16)                       # (L, H, H)
    wk = stack("wk", jnp.bfloat16)
    wv = stack("wv", jnp.bfloat16)
    wo = stack("wo", jnp.bfloat16)                       # (L, H, H)  (plain, not head-major)
    w1 = stack("w1", jnp.bfloat16)                       # (L, H, P)
    w2 = stack("w2", jnp.bfloat16)                       # (L, P, H)
    bq = stack("bq", jnp.float32)                        # (L, 1, H)
    bk = stack("bk", jnp.float32)
    bv = stack("bv", jnp.float32)
    bo = stack("bo", jnp.float32)
    b1 = stack("b1", jnp.float32)                        # (L, 1, P)
    b2 = stack("b2", jnp.float32)
    ln_g = stack("ln_g", jnp.float32)
    ln_b = stack("ln_b", jnp.float32)

    def per_batch(shape):
        nd = len(shape)
        return pl.BlockSpec(shape, lambda b, l, _nd=nd: (b,) + (0,) * (_nd - 1))

    def per_layer(shape):
        nd = len(shape)
        return pl.BlockSpec(shape, lambda b, l, _nd=nd: (l,) + (0,) * (_nd - 1))

    kernel = functools.partial(encoder_kernel, n_heads=n_heads,
                               head_dim=head_dim, block_b=Bb, seq_len=S)

    steps = B // Bb
    # Advisory cost estimate so XLA can schedule the surrounding glue sensibly.
    flops_per_step = Bb * S * (8 * H * H + 4 * S * H + 4 * H * P)
    cost = pl.CostEstimate(
        flops=int(steps * L * flops_per_step),
        transcendentals=int(B * L * n_heads * S * S),
        bytes_accessed=int(steps * L * (4 * H * H + 2 * H * P) * 2   # bf16 weights
                           + 2 * B * S * H * 4),                     # activations in/out
    )

    out_flat = pl.pallas_call(
        kernel,
        out_shape=jax.ShapeDtypeStruct((B * S, H), jnp.float32),
        grid_spec=pltpu.PrefetchScalarGridSpec(
            num_scalar_prefetch=0,
            grid=(steps, L),
            in_specs=[
                per_batch((Bb, 1, S)),                       # mask bias
                per_batch((Bb * S, H)),                      # embedded input
                per_layer((1, H, H)),                        # wq
                per_layer((1, 1, H)),                        # bq
                per_layer((1, H, H)),                        # wk
                per_layer((1, 1, H)),                        # bk
                per_layer((1, H, H)),                        # wv
                per_layer((1, 1, H)),                        # bv
                per_layer((1, H, H)),                        # wo
                per_layer((1, 1, H)),                        # bo
                per_layer((1, 1, H)),                        # ln_g
                per_layer((1, 1, H)),                        # ln_b
                per_layer((1, H, P)),                        # w1
                per_layer((1, 1, P)),                        # b1
                per_layer((1, P, H)),                        # w2
                per_layer((1, 1, H)),                        # b2
            ],
            out_specs=pl.BlockSpec((Bb * S, H), lambda b, l: (b, 0)),
            scratch_shapes=[pltpu.VMEM((Bb * S, H), jnp.bfloat16)],  # ctx (head concat)
        ),
        compiler_params=pltpu.CompilerParams(
            dimension_semantics=("parallel", "arbitrary"),
            # 48 MiB: safe on v7x (64 MiB physical); raise toward 96-110 MiB on
            # v5e/v6e (128 MiB physical) for larger batch blocks.
            vmem_limit_bytes=48 * 1024 * 1024),
        cost_estimate=cost,
    )(bias, x, wq, bq, wk, bk, wv, bv, wo, bo, ln_g, ln_b, w1, b1, w2, b2)

    return out_flat.reshape(B, S, H)


# ----------------------------------------------------------------------------
# Pure-JAX reference. mxu_dtype=f32 -> faithful f32 reference;
# mxu_dtype=bf16 -> mirrors the kernel's mixed precision (bf16 MXU, f32 accum).
# ----------------------------------------------------------------------------
def encoder_forward_ref(src, params, *, pad_idx, n_heads, mxu_dtype=jnp.float32):
    B, S = src.shape
    H = params["token_emb"].shape[1]
    hd = H // n_heads
    inv_scale = 1.0 / (hd ** 0.5)
    bias = jnp.where(src != pad_idx, 0.0, -1e10).astype(jnp.float32)[:, None, None, :]
    x = (params["token_emb"][src] * jnp.sqrt(jnp.float32(H))
         + params["pos_emb"][jnp.arange(S)][None, :, :])

    def mm(a, w):
        return jnp.dot(a.astype(mxu_dtype), w.astype(mxu_dtype),
                       preferred_element_type=jnp.float32)

    def ln(z, g, b):
        mu = jnp.mean(z, axis=-1, keepdims=True)
        var = jnp.mean((z - mu) ** 2, axis=-1, keepdims=True)
        return (z - mu) / jnp.sqrt(var + 1e-5) * g + b

    for p in params["layers"]:
        q = (mm(x, p["wq"]) + p["bq"]) * inv_scale
        k = mm(x, p["wk"]) + p["bk"]
        v = mm(x, p["wv"]) + p["bv"]
        q = q.reshape(B, S, n_heads, hd).transpose(0, 2, 1, 3)
        k = k.reshape(B, S, n_heads, hd).transpose(0, 2, 1, 3)
        v = v.reshape(B, S, n_heads, hd).transpose(0, 2, 1, 3)
        energy = jnp.einsum("bhqd,bhkd->bhqk",
                            q.astype(mxu_dtype), k.astype(mxu_dtype),
                            preferred_element_type=jnp.float32) + bias
        attn = jax.nn.softmax(energy, axis=-1)
        ctx = jnp.einsum("bhqk,bhkd->bhqd",
                         attn.astype(mxu_dtype), v.astype(mxu_dtype),
                         preferred_element_type=jnp.float32)
        ctx = ctx.transpose(0, 2, 1, 3).reshape(B, S, H)
        attn_out = mm(ctx, p["wo"]) + p["bo"]
        x = ln(x + attn_out, p["ln_g"], p["ln_b"])
        ff = mm(jnp.maximum(mm(x, p["w1"]) + p["b1"], 0.0), p["w2"]) + p["b2"]
        x = ln(x + ff, p["ln_g"], p["ln_b"])
    return x


# ----------------------------------------------------------------------------
# Deterministic parameter init + demo.
# NOTE: the PyTorch EncoderLayer reuses a single nn.LayerNorm for both
# sub-layers, so sharing (ln_g, ln_b) inside a layer matches the spec.
# ----------------------------------------------------------------------------
def init_params(key, *, vocab, max_len, hid_dim, pf_dim, n_layers):
    keys = jax.random.split(key, 2 + n_layers)
    params = {
        "token_emb": jax.random.normal(keys[0], (vocab, hid_dim), jnp.float32) * 0.02,
        "pos_emb": jax.random.normal(keys[1], (max_len, hid_dim), jnp.float32) * 0.02,
        "layers": [],
    }
    for li in range(n_layers):
        ks = jax.random.split(keys[2 + li], 8)
        H, P = hid_dim, pf_dim
        s = 0.05
        params["layers"].append({
            "wq": jax.random.normal(ks[0], (H, H), jnp.float32) * s,
            "bq": jnp.zeros((1, H), jnp.float32),
            "wk": jax.random.normal(ks[1], (H, H), jnp.float32) * s,
            "bk": jnp.zeros((1, H), jnp.float32),
            "wv": jax.random.normal(ks[2], (H, H), jnp.float32) * s,
            "bv": jnp.zeros((1, H), jnp.float32),
            "wo": jax.random.normal(ks[3], (H, H), jnp.float32) * s,
            "bo": jnp.zeros((1, H), jnp.float32),
            "ln_g": jnp.ones((1, H), jnp.float32),
            "ln_b": jnp.zeros((1, H), jnp.float32),
            "w1": jax.random.normal(ks[4], (H, P), jnp.float32) * s,
            "b1": jnp.zeros((1, P), jnp.float32),
            "w2": jax.random.normal(ks[5], (P, H), jnp.float32) * s,
            "b2": jnp.zeros((1, H), jnp.float32),
        })
    return params


if __name__ == "__main__":
    B, S = 4, 8
    VOCAB, MAX_LEN = 50, 16
    HID, N_HEADS, PF, N_LAYERS = 32, 4, 64, 2
    PAD_IDX = 0

    key = jax.random.PRNGKey(0)
    k_tok, k_par = jax.random.split(key)

    src = jax.random.randint(k_tok, (B, S), 1, VOCAB, dtype=jnp.int32)
    # introduce some padding so the mask path is exercised
    src = src.at[0, -2:].set(PAD_IDX)
    src = src.at[1, -1:].set(PAD_IDX)
    src = src.at[3, -3:].set(PAD_IDX)

    params = init_params(k_par, vocab=VOCAB, max_len=MAX_LEN,
                         hid_dim=HID, pf_dim=PF, n_layers=N_LAYERS)

    # Bblk = 2 -> grid (2, L): exercises batch blocking AND keeps the parallel
    # batch axis >= 2 (both v7x TensorCores busy).
    out = encoder_forward(src, params, pad_idx=PAD_IDX, n_heads=N_HEADS,
                          block_batch=2)
    out = jax.block_until_ready(out)
    assert out.shape == (B, S, HID), out.shape

    # Tight check vs. a reference with the same mixed precision as the kernel.
    ref_mixed = jax.block_until_ready(
        encoder_forward_ref(src, params, pad_idx=PAD_IDX, n_heads=N_HEADS,
                            mxu_dtype=jnp.bfloat16))
    err_mixed = float(jnp.max(jnp.abs(out - ref_mixed)))
    assert err_mixed < 3e-2, f"mixed-precision mismatch: {err_mixed}"

    # Coarse check vs. the faithful f32 reference (bf16 MXU rounding budget).
    ref_f32 = jax.block_until_ready(
        encoder_forward_ref(src, params, pad_idx=PAD_IDX, n_heads=N_HEADS,
                            mxu_dtype=jnp.float32))
    err_f32 = float(jnp.max(jnp.abs(out - ref_f32)))
    assert err_f32 < 1e-1, f"f32-reference mismatch: {err_f32}"

    print("KERNEL_OK")
</pallas_src>

<mosaic_0001>
module attributes {stable_mosaic.version = 11 : i64} {
  func.func @encoder_kernel(%arg0: i32, %arg1: i32, %arg2: memref<2x1x8xf32, #tpu.memory_space<vmem>>, %arg3: memref<16x32xf32, #tpu.memory_space<vmem>>, %arg4: memref<1x32x32xbf16, #tpu.memory_space<vmem>>, %arg5: memref<1x1x32xf32, #tpu.memory_space<vmem>>, %arg6: memref<1x32x32xbf16, #tpu.memory_space<vmem>>, %arg7: memref<1x1x32xf32, #tpu.memory_space<vmem>>, %arg8: memref<1x32x32xbf16, #tpu.memory_space<vmem>>, %arg9: memref<1x1x32xf32, #tpu.memory_space<vmem>>, %arg10: memref<1x32x32xbf16, #tpu.memory_space<vmem>>, %arg11: memref<1x1x32xf32, #tpu.memory_space<vmem>>, %arg12: memref<1x1x32xf32, #tpu.memory_space<vmem>>, %arg13: memref<1x1x32xf32, #tpu.memory_space<vmem>>, %arg14: memref<1x32x64xbf16, #tpu.memory_space<vmem>>, %arg15: memref<1x1x64xf32, #tpu.memory_space<vmem>>, %arg16: memref<1x64x32xbf16, #tpu.memory_space<vmem>>, %arg17: memref<1x1x32xf32, #tpu.memory_space<vmem>>, %arg18: memref<16x32xf32, #tpu.memory_space<vmem>>, %arg19: memref<16x32xbf16, #tpu.memory_space<vmem>>) attributes {dimension_semantics = [#tpu.dimension_semantics<parallel>, #tpu.dimension_semantics<arbitrary>], iteration_bounds = array<i64: 2, 2>, scalar_prefetch = 0 : i64, scratch_operands = 1 : i64, tpu.core_type = #tpu.core_type<tc>, window_params = [{transform_indices = @transform_0, window_bounds = array<i64: 2, 1, 8>}, {transform_indices = @transform_1, window_bounds = array<i64: 16, 32>}, {transform_indices = @transform_2, window_bounds = array<i64: 1, 32, 32>}, {transform_indices = @transform_3, window_bounds = array<i64: 1, 1, 32>}, {transform_indices = @transform_4, window_bounds = array<i64: 1, 32, 32>}, {transform_indices = @transform_5, window_bounds = array<i64: 1, 1, 32>}, {transform_indices = @transform_6, window_bounds = array<i64: 1, 32, 32>}, {transform_indices = @transform_7, window_bounds = array<i64: 1, 1, 32>}, {transform_indices = @transform_8, window_bounds = array<i64: 1, 32, 32>}, {transform_indices = @transform_9, window_bounds = array<i64: 1, 1, 32>}, {transform_indices = @transform_10, window_bounds = array<i64: 1, 1, 32>}, {transform_indices = @transform_11, window_bounds = array<i64: 1, 1, 32>}, {transform_indices = @transform_12, window_bounds = array<i64: 1, 32, 64>}, {transform_indices = @transform_13, window_bounds = array<i64: 1, 1, 64>}, {transform_indices = @transform_14, window_bounds = array<i64: 1, 64, 32>}, {transform_indices = @transform_15, window_bounds = array<i64: 1, 1, 32>}, {transform_indices = @transform_16, window_bounds = array<i64: 16, 32>}]} {
    %c0_i32 = arith.constant 0 : i32
    %0 = arith.cmpi eq, %arg1, %c0_i32 : i32
    %1 = arith.extui %0 : i1 to i32
    %c0_i32_0 = arith.constant 0 : i32
    %2 = arith.cmpi ne, %1, %c0_i32_0 : i32
    scf.if %2 {
      %c0_113 = arith.constant 0 : index
      %c0_114 = arith.constant 0 : index
      %306 = vector.load %arg3[%c0_113, %c0_114] : memref<16x32xf32, #tpu.memory_space<vmem>>, vector<16x32xf32>
      %c0_115 = arith.constant 0 : index
      %c0_116 = arith.constant 0 : index
      %307 = vector.load %arg18[%c0_115, %c0_116] : memref<16x32xf32, #tpu.memory_space<vmem>>, vector<16x32xf32>
      tpu.vector_store %arg18[%c0_115, %c0_116], %306 {strides = array<i32>} : memref<16x32xf32, #tpu.memory_space<vmem>>, vector<16x32xf32>,
    } else {
    }
    %c0 = arith.constant 0 : index
    %c0_1 = arith.constant 0 : index
    %3 = vector.load %arg18[%c0, %c0_1] : memref<16x32xf32, #tpu.memory_space<vmem>>, vector<16x32xf32>
    %4 = arith.truncf %3 : vector<16x32xf32> to vector<16x32xbf16>
    %c0_2 = arith.constant 0 : index
    %c0_3 = arith.constant 0 : index
    %c0_4 = arith.constant 0 : index
    %5 = vector.load %arg4[%c0_2, %c0_3, %c0_4] : memref<1x32x32xbf16, #tpu.memory_space<vmem>>, vector<1x32x32xbf16>
    %6 = vector.shape_cast %5 : vector<1x32x32xbf16> to vector<32x32xbf16>
    %cst = arith.constant dense<0.000000e+00> : vector<16x32xf32>
    %7 = tpu.matmul %4, %6, %cst {dimension_numbers = #tpu.dot_dimension_numbers<[1], [0], [0], [1], [0, 0, 1, 1], [], []>} : vector<16x32xbf16>, vector<32x32xbf16>, vector<16x32xf32> -> vector<16x32xf32>
    %c0_5 = arith.constant 0 : index
    %c0_6 = arith.constant 0 : index
    %c0_7 = arith.constant 0 : index
    %8 = vector.load %arg5[%c0_5, %c0_6, %c0_7] : memref<1x1x32xf32, #tpu.memory_space<vmem>>, vector<1x1x32xf32>
    %9 = vector.shape_cast %8 : vector<1x1x32xf32> to vector<1x32xf32>
    %10 = vector.broadcast %9 : vector<1x32xf32> to vector<16x32xf32>
    %11 = arith.addf %7, %10 : vector<16x32xf32>
    %cst_8 = arith.constant 0.353553385 : f32
    %12 = vector.broadcast %cst_8 : f32 to vector<16x32xf32>
    %13 = arith.mulf %11, %12 : vector<16x32xf32>
    %c0_9 = arith.constant 0 : index
    %c0_10 = arith.constant 0 : index
    %c0_11 = arith.constant 0 : index
    %14 = vector.load %arg6[%c0_9, %c0_10, %c0_11] : memref<1x32x32xbf16, #tpu.memory_space<vmem>>, vector<1x32x32xbf16>
    %15 = vector.shape_cast %14 : vector<1x32x32xbf16> to vector<32x32xbf16>
    %cst_12 = arith.constant dense<0.000000e+00> : vector<16x32xf32>
    %16 = tpu.matmul %4, %15, %cst_12 {dimension_numbers = #tpu.dot_dimension_numbers<[1], [0], [0], [1], [0, 0, 1, 1], [], []>} : vector<16x32xbf16>, vector<32x32xbf16>, vector<16x32xf32> -> vector<16x32xf32>
    %c0_13 = arith.constant 0 : index
    %c0_14 = arith.constant 0 : index
    %c0_15 = arith.constant 0 : index
    %17 = vector.load %arg7[%c0_13, %c0_14, %c0_15] : memref<1x1x32xf32, #tpu.memory_space<vmem>>, vector<1x1x32xf32>
    %18 = vector.shape_cast %17 : vector<1x1x32xf32> to vector<1x32xf32>
    %19 = vector.broadcast %18 : vector<1x32xf32> to vector<16x32xf32>
    %20 = arith.addf %16, %19 : vector<16x32xf32>
    %c0_16 = arith.constant 0 : index
    %c0_17 = arith.constant 0 : index
    %c0_18 = arith.constant 0 : index
    %21 = vector.load %arg8[%c0_16, %c0_17, %c0_18] : memref<1x32x32xbf16, #tpu.memory_space<vmem>>, vector<1x32x32xbf16>
    %22 = vector.shape_cast %21 : vector<1x32x32xbf16> to vector<32x32xbf16>
    %cst_19 = arith.constant dense<0.000000e+00> : vector<16x32xf32>
    %23 = tpu.matmul %4, %22, %cst_19 {dimension_numbers = #tpu.dot_dimension_numbers<[1], [0], [0], [1], [0, 0, 1, 1], [], []>} : vector<16x32xbf16>, vector<32x32xbf16>, vector<16x32xf32> -> vector<16x32xf32>
    %c0_20 = arith.constant 0 : index
    %c0_21 = arith.constant 0 : index
    %c0_22 = arith.constant 0 : index
    %24 = vector.load %arg9[%c0_20, %c0_21, %c0_22] : memref<1x1x32xf32, #tpu.memory_space<vmem>>, vector<1x1x32xf32>
    %25 = vector.shape_cast %24 : vector<1x1x32xf32> to vector<1x32xf32>
    %26 = vector.broadcast %25 : vector<1x32xf32> to vector<16x32xf32>
    %27 = arith.addf %23, %26 : vector<16x32xf32>
    %c0_23 = arith.constant 0 : index
    %c0_24 = arith.constant 0 : index
    %c0_25 = arith.constant 0 : index
    %28 = vector.load %arg2[%c0_23, %c0_24, %c0_25] : memref<2x1x8xf32, #tpu.memory_space<vmem>>, vector<2x1x8xf32>
    %29 = vector.extract_strided_slice %13 {offsets = [0, 0], sizes = [8, 8], strides = [1, 1]} : vector<16x32xf32> to vector<8x8xf32>
    %30 = arith.truncf %29 : vector<8x8xf32> to vector<8x8xbf16>
    %31 = vector.extract_strided_slice %20 {offsets = [0, 0], sizes = [8, 8], strides = [1, 1]} : vector<16x32xf32> to vector<8x8xf32>
    %32 = arith.truncf %31 : vector<8x8xf32> to vector<8x8xbf16>
    %33 = vector.extract_strided_slice %27 {offsets = [0, 0], sizes = [8, 8], strides = [1, 1]} : vector<16x32xf32> to vector<8x8xf32>
    %34 = arith.truncf %33 : vector<8x8xf32> to vector<8x8xbf16>
    %cst_26 = arith.constant dense<0.000000e+00> : vector<8x8xf32>
    %35 = tpu.matmul %30, %32, %cst_26 {dimension_numbers = #tpu.dot_dimension_numbers<[1], [1], [0], [0], [0, 0, 1, 0], [], []>} : vector<8x8xbf16>, vector<8x8xbf16>, vector<8x8xf32> -> vector<8x8xf32>
    %36 = vector.extract_strided_slice %28 {offsets = [0, 0, 0], sizes = [1, 1, 8], strides = [1, 1, 1]} : vector<2x1x8xf32> to vector<1x1x8xf32>
    %37 = vector.shape_cast %36 : vector<1x1x8xf32> to vector<1x8xf32>
    %38 = vector.broadcast %37 : vector<1x8xf32> to vector<8x8xf32>
    %39 = arith.addf %35, %38 : vector<8x8xf32>
    %cst_27 = arith.constant dense<0xFF800000> : vector<8xf32>
    %40 = vector.multi_reduction <maximumf>, %39, %cst_27 [1] : vector<8x8xf32> to vector<8xf32>
    %41 = vector.shape_cast %40 : vector<8xf32> to vector<8x1xf32>
    %42 = vector.broadcast %41 : vector<8x1xf32> to vector<8x8xf32>
    %43 = arith.subf %39, %42 : vector<8x8xf32>
    %44 = math.exp %43 : vector<8x8xf32>
    %cst_28 = arith.constant dense<0.000000e+00> : vector<8xf32>
    %45 = vector.multi_reduction <add>, %44, %cst_28 [1] : vector<8x8xf32> to vector<8xf32>
    %46 = vector.shape_cast %45 : vector<8xf32> to vector<8x1xf32>
    %47 = tpu.reciprocal %46 {approx = true} : vector<8x1xf32> -> vector<8x1xf32>
    %48 = vector.broadcast %47 : vector<8x1xf32> to vector<8x8xf32>
    %49 = arith.mulf %44, %48 : vector<8x8xf32>
    %50 = arith.truncf %49 : vector<8x8xf32> to vector<8x8xbf16>
    %cst_29 = arith.constant dense<0.000000e+00> : vector<8x8xf32>
    %51 = tpu.matmul %50, %34, %cst_29 {dimension_numbers = #tpu.dot_dimension_numbers<[1], [0], [0], [1], [0, 0, 1, 1], [], []>} : vector<8x8xbf16>, vector<8x8xbf16>, vector<8x8xf32> -> vector<8x8xf32>
    %52 = arith.truncf %51 : vector<8x8xf32> to vector<8x8xbf16>
    %c0_30 = arith.constant 0 : index
    %c0_31 = arith.constant 0 : index
    %53 = vector.load %arg19[%c0_30, %c0_31] : memref<16x32xbf16, #tpu.memory_space<vmem>>, vector<8x8xbf16>
    tpu.vector_store %arg19[%c0_30, %c0_31], %52 {strides = array<i32>} : memref<16x32xbf16, #tpu.memory_space<vmem>>, vector<8x8xbf16>,
    %54 = vector.extract_strided_slice %13 {offsets = [8, 0], sizes = [8, 8], strides = [1, 1]} : vector<16x32xf32> to vector<8x8xf32>
    %55 = arith.truncf %54 : vector<8x8xf32> to vector<8x8xbf16>
    %56 = vector.extract_strided_slice %20 {offsets = [8, 0], sizes = [8, 8], strides = [1, 1]} : vector<16x32xf32> to vector<8x8xf32>
    %57 = arith.truncf %56 : vector<8x8xf32> to vector<8x8xbf16>
    %58 = vector.extract_strided_slice %27 {offsets = [8, 0], sizes = [8, 8], strides = [1, 1]} : vector<16x32xf32> to vector<8x8xf32>
    %59 = arith.truncf %58 : vector<8x8xf32> to vector<8x8xbf16>
    %cst_32 = arith.constant dense<0.000000e+00> : vector<8x8xf32>
    %60 = tpu.matmul %55, %57, %cst_32 {dimension_numbers = #tpu.dot_dimension_numbers<[1], [1], [0], [0], [0, 0, 1, 0], [], []>} : vector<8x8xbf16>, vector<8x8xbf16>, vector<8x8xf32> -> vector<8x8xf32>
    %61 = vector.extract_strided_slice %28 {offsets = [1, 0, 0], sizes = [1, 1, 8], strides = [1, 1, 1]} : vector<2x1x8xf32> to vector<1x1x8xf32>
    %62 = vector.shape_cast %61 : vector<1x1x8xf32> to vector<1x8xf32>
    %63 = vector.broadcast %62 : vector<1x8xf32> to vector<8x8xf32>
    %64 = arith.addf %60, %63 : vector<8x8xf32>
    %cst_33 = arith.constant dense<0xFF800000> : vector<8xf32>
    %65 = vector.multi_reduction <maximumf>, %64, %cst_33 [1] : vector<8x8xf32> to vector<8xf32>
    %66 = vector.shape_cast %65 : vector<8xf32> to vector<8x1xf32>
    %67 = vector.broadcast %66 : vector<8x1xf32> to vector<8x8xf32>
    %68 = arith.subf %64, %67 : vector<8x8xf32>
    %69 = math.exp %68 : vector<8x8xf32>
    %cst_34 = arith.constant dense<0.000000e+00> : vector<8xf32>
    %70 = vector.multi_reduction <add>, %69, %cst_34 [1] : vector<8x8xf32> to vector<8xf32>
    %71 = vector.shape_cast %70 : vector<8xf32> to vector<8x1xf32>
    %72 = tpu.reciprocal %71 {approx = true} : vector<8x1xf32> -> vector<8x1xf32>
    %73 = vector.broadcast %72 : vector<8x1xf32> to vector<8x8xf32>
    %74 = arith.mulf %69, %73 : vector<8x8xf32>
    %75 = arith.truncf %74 : vector<8x8xf32> to vector<8x8xbf16>
    %cst_35 = arith.constant dense<0.000000e+00> : vector<8x8xf32>
    %76 = tpu.matmul %75, %59, %cst_35 {dimension_numbers = #tpu.dot_dimension_numbers<[1], [0], [0], [1], [0, 0, 1, 1], [], []>} : vector<8x8xbf16>, vector<8x8xbf16>, vector<8x8xf32> -> vector<8x8xf32>
    %77 = arith.truncf %76 : vector<8x8xf32> to vector<8x8xbf16>
    %c8 = arith.constant 8 : index
    %c0_36 = arith.constant 0 : index
    %78 = vector.load %arg19[%c8, %c0_36] : memref<16x32xbf16, #tpu.memory_space<vmem>>, vector<8x8xbf16>
    tpu.vector_store %arg19[%c8, %c0_36], %77 {strides = array<i32>} : memref<16x32xbf16, #tpu.memory_space<vmem>>, vector<8x8xbf16>,
    %79 = vector.extract_strided_slice %13 {offsets = [0, 8], sizes = [8, 8], strides = [1, 1]} : vector<16x32xf32> to vector<8x8xf32>
    %80 = arith.truncf %79 : vector<8x8xf32> to vector<8x8xbf16>
    %81 = vector.extract_strided_slice %20 {offsets = [0, 8], sizes = [8, 8], strides = [1, 1]} : vector<16x32xf32> to vector<8x8xf32>
    %82 = arith.truncf %81 : vector<8x8xf32> to vector<8x8xbf16>
    %83 = vector.extract_strided_slice %27 {offsets = [0, 8], sizes = [8, 8], strides = [1, 1]} : vector<16x32xf32> to vector<8x8xf32>
    %84 = arith.truncf %83 : vector<8x8xf32> to vector<8x8xbf16>
    %cst_37 = arith.constant dense<0.000000e+00> : vector<8x8xf32>
    %85 = tpu.matmul %80, %82, %cst_37 {dimension_numbers = #tpu.dot_dimension_numbers<[1], [1], [0], [0], [0, 0, 1, 0], [], []>} : vector<8x8xbf16>, vector<8x8xbf16>, vector<8x8xf32> -> vector<8x8xf32>
    %86 = vector.extract_strided_slice %28 {offsets = [0, 0, 0], sizes = [1, 1, 8], strides = [1, 1, 1]} : vector<2x1x8xf32> to vector<1x1x8xf32>
    %87 = vector.shape_cast %86 : vector<1x1x8xf32> to vector<1x8xf32>
    %88 = vector.broadcast %87 : vector<1x8xf32> to vector<8x8xf32>
    %89 = arith.addf %85, %88 : vector<8x8xf32>
    %cst_38 = arith.constant dense<0xFF800000> : vector<8xf32>
    %90 = vector.multi_reduction <maximumf>, %89, %cst_38 [1] : vector<8x8xf32> to vector<8xf32>
    %91 = vector.shape_cast %90 : vector<8xf32> to vector<8x1xf32>
    %92 = vector.broadcast %91 : vector<8x1xf32> to vector<8x8xf32>
    %93 = arith.subf %89, %92 : vector<8x8xf32>
    %94 = math.exp %93 : vector<8x8xf32>
    %cst_39 = arith.constant dense<0.000000e+00> : vector<8xf32>
    %95 = vector.multi_reduction <add>, %94, %cst_39 [1] : vector<8x8xf32> to vector<8xf32>
    %96 = vector.shape_cast %95 : vector<8xf32> to vector<8x1xf32>
    %97 = tpu.reciprocal %96 {approx = true} : vector<8x1xf32> -> vector<8x1xf32>
    %98 = vector.broadcast %97 : vector<8x1xf32> to vector<8x8xf32>
    %99 = arith.mulf %94, %98 : vector<8x8xf32>
    %100 = arith.truncf %99 : vector<8x8xf32> to vector<8x8xbf16>
    %cst_40 = arith.constant dense<0.000000e+00> : vector<8x8xf32>
    %101 = tpu.matmul %100, %84, %cst_40 {dimension_numbers = #tpu.dot_dimension_numbers<[1], [0], [0], [1], [0, 0, 1, 1], [], []>} : vector<8x8xbf16>, vector<8x8xbf16>, vector<8x8xf32> -> vector<8x8xf32>
    %102 = arith.truncf %101 : vector<8x8xf32> to vector<8x8xbf16>
    %c0_41 = arith.constant 0 : index
    %c8_42 = arith.constant 8 : index
    %103 = vector.load %arg19[%c0_41, %c8_42] : memref<16x32xbf16, #tpu.memory_space<vmem>>, vector<8x8xbf16>
    tpu.vector_store %arg19[%c0_41, %c8_42], %102 {strides = array<i32>} : memref<16x32xbf16, #tpu.memory_space<vmem>>, vector<8x8xbf16>,
    %104 = vector.extract_strided_slice %13 {offsets = [8, 8], sizes = [8, 8], strides = [1, 1]} : vector<16x32xf32> to vector<8x8xf32>
    %105 = arith.truncf %104 : vector<8x8xf32> to vector<8x8xbf16>
    %106 = vector.extract_strided_slice %20 {offsets = [8, 8], sizes = [8, 8], strides = [1, 1]} : vector<16x32xf32> to vector<8x8xf32>
    %107 = arith.truncf %106 : vector<8x8xf32> to vector<8x8xbf16>
    %108 = vector.extract_strided_slice %27 {offsets = [8, 8], sizes = [8, 8], strides = [1, 1]} : vector<16x32xf32> to vector<8x8xf32>
    %109 = arith.truncf %108 : vector<8x8xf32> to vector<8x8xbf16>
    %cst_43 = arith.constant dense<0.000000e+00> : vector<8x8xf32>
    %110 = tpu.matmul %105, %107, %cst_43 {dimension_numbers = #tpu.dot_dimension_numbers<[1], [1], [0], [0], [0, 0, 1, 0], [], []>} : vector<8x8xbf16>, vector<8x8xbf16>, vector<8x8xf32> -> vector<8x8xf32>
    %111 = vector.extract_strided_slice %28 {offsets = [1, 0, 0], sizes = [1, 1, 8], strides = [1, 1, 1]} : vector<2x1x8xf32> to vector<1x1x8xf32>
    %112 = vector.shape_cast %111 : vector<1x1x8xf32> to vector<1x8xf32>
    %113 = vector.broadcast %112 : vector<1x8xf32> to vector<8x8xf32>
    %114 = arith.addf %110, %113 : vector<8x8xf32>
    %cst_44 = arith.constant dense<0xFF800000> : vector<8xf32>
    %115 = vector.multi_reduction <maximumf>, %114, %cst_44 [1] : vector<8x8xf32> to vector<8xf32>
    %116 = vector.shape_cast %115 : vector<8xf32> to vector<8x1xf32>
    %117 = vector.broadcast %116 : vector<8x1xf32> to vector<8x8xf32>
    %118 = arith.subf %114, %117 : vector<8x8xf32>
    %119 = math.exp %118 : vector<8x8xf32>
    %cst_45 = arith.constant dense<0.000000e+00> : vector<8xf32>
    %120 = vector.multi_reduction <add>, %119, %cst_45 [1] : vector<8x8xf32> to vector<8xf32>
    %121 = vector.shape_cast %120 : vector<8xf32> to vector<8x1xf32>
    %122 = tpu.reciprocal %121 {approx = true} : vector<8x1xf32> -> vector<8x1xf32>
    %123 = vector.broadcast %122 : vector<8x1xf32> to vector<8x8xf32>
    %124 = arith.mulf %119, %123 : vector<8x8xf32>
    %125 = arith.truncf %124 : vector<8x8xf32> to vector<8x8xbf16>
    %cst_46 = arith.constant dense<0.000000e+00> : vector<8x8xf32>
    %126 = tpu.matmul %125, %109, %cst_46 {dimension_numbers = #tpu.dot_dimension_numbers<[1], [0], [0], [1], [0, 0, 1, 1], [], []>} : vector<8x8xbf16>, vector<8x8xbf16>, vector<8x8xf32> -> vector<8x8xf32>
    %127 = arith.truncf %126 : vector<8x8xf32> to vector<8x8xbf16>
    %c8_47 = arith.constant 8 : index
    %c8_48 = arith.constant 8 : index
    %128 = vector.load %arg19[%c8_47, %c8_48] : memref<16x32xbf16, #tpu.memory_space<vmem>>, vector<8x8xbf16>
    tpu.vector_store %arg19[%c8_47, %c8_48], %127 {strides = array<i32>} : memref<16x32xbf16, #tpu.memory_space<vmem>>, vector<8x8xbf16>,
    %129 = vector.extract_strided_slice %13 {offsets = [0, 16], sizes = [8, 8], strides = [1, 1]} : vector<16x32xf32> to vector<8x8xf32>
    %130 = arith.truncf %129 : vector<8x8xf32> to vector<8x8xbf16>
    %131 = vector.extract_strided_slice %20 {offsets = [0, 16], sizes = [8, 8], strides = [1, 1]} : vector<16x32xf32> to vector<8x8xf32>
    %132 = arith.truncf %131 : vector<8x8xf32> to vector<8x8xbf16>
    %133 = vector.extract_strided_slice %27 {offsets = [0, 16], sizes = [8, 8], strides = [1, 1]} : vector<16x32xf32> to vector<8x8xf32>
    %134 = arith.truncf %133 : vector<8x8xf32> to vector<8x8xbf16>
    %cst_49 = arith.constant dense<0.000000e+00> : vector<8x8xf32>
    %135 = tpu.matmul %130, %132, %cst_49 {dimension_numbers = #tpu.dot_dimension_numbers<[1], [1], [0], [0], [0, 0, 1, 0], [], []>} : vector<8x8xbf16>, vector<8x8xbf16>, vector<8x8xf32> -> vector<8x8xf32>
    %136 = vector.extract_strided_slice %28 {offsets = [0, 0, 0], sizes = [1, 1, 8], strides = [1, 1, 1]} : vector<2x1x8xf32> to vector<1x1x8xf32>
    %137 = vector.shape_cast %136 : vector<1x1x8xf32> to vector<1x8xf32>
    %138 = vector.broadcast %137 : vector<1x8xf32> to vector<8x8xf32>
    %139 = arith.addf %135, %138 : vector<8x8xf32>
    %cst_50 = arith.constant dense<0xFF800000> : vector<8xf32>
    %140 = vector.multi_reduction <maximumf>, %139, %cst_50 [1] : vector<8x8xf32> to vector<8xf32>
    %141 = vector.shape_cast %140 : vector<8xf32> to vector<8x1xf32>
    %142 = vector.broadcast %141 : vector<8x1xf32> to vector<8x8xf32>
    %143 = arith.subf %139, %142 : vector<8x8xf32>
    %144 = math.exp %143 : vector<8x8xf32>
    %cst_51 = arith.constant dense<0.000000e+00> : vector<8xf32>
    %145 = vector.multi_reduction <add>, %144, %cst_51 [1] : vector<8x8xf32> to vector<8xf32>
    %146 = vector.shape_cast %145 : vector<8xf32> to vector<8x1xf32>
    %147 = tpu.reciprocal %146 {approx = true} : vector<8x1xf32> -> vector<8x1xf32>
    %148 = vector.broadcast %147 : vector<8x1xf32> to vector<8x8xf32>
    %149 = arith.mulf %144, %148 : vector<8x8xf32>
    %150 = arith.truncf %149 : vector<8x8xf32> to vector<8x8xbf16>
    %cst_52 = arith.constant dense<0.000000e+00> : vector<8x8xf32>
    %151 = tpu.matmul %150, %134, %cst_52 {dimension_numbers = #tpu.dot_dimension_numbers<[1], [0], [0], [1], [0, 0, 1, 1], [], []>} : vector<8x8xbf16>, vector<8x8xbf16>, vector<8x8xf32> -> vector<8x8xf32>
    %152 = arith.truncf %151 : vector<8x8xf32> to vector<8x8xbf16>
    %c0_53 = arith.constant 0 : index
    %c16 = arith.constant 16 : index
    %153 = vector.load %arg19[%c0_53, %c16] : memref<16x32xbf16, #tpu.memory_space<vmem>>, vector<8x8xbf16>
    tpu.vector_store %arg19[%c0_53, %c16], %152 {strides = array<i32>} : memref<16x32xbf16, #tpu.memory_space<vmem>>, vector<8x8xbf16>,
    %154 = vector.extract_strided_slice %13 {offsets = [8, 16], sizes = [8, 8], strides = [1, 1]} : vector<16x32xf32> to vector<8x8xf32>
    %155 = arith.truncf %154 : vector<8x8xf32> to vector<8x8xbf16>
    %156 = vector.extract_strided_slice %20 {offsets = [8, 16], sizes = [8, 8], strides = [1, 1]} : vector<16x32xf32> to vector<8x8xf32>
    %157 = arith.truncf %156 : vector<8x8xf32> to vector<8x8xbf16>
    %158 = vector.extract_strided_slice %27 {offsets = [8, 16], sizes = [8, 8], strides = [1, 1]} : vector<16x32xf32> to vector<8x8xf32>
    %159 = arith.truncf %158 : vector<8x8xf32> to vector<8x8xbf16>
    %cst_54 = arith.constant dense<0.000000e+00> : vector<8x8xf32>
    %160 = tpu.matmul %155, %157, %cst_54 {dimension_numbers = #tpu.dot_dimension_numbers<[1], [1], [0], [0], [0, 0, 1, 0], [], []>} : vector<8x8xbf16>, vector<8x8xbf16>, vector<8x8xf32> -> vector<8x8xf32>
    %161 = vector.extract_strided_slice %28 {offsets = [1, 0, 0], sizes = [1, 1, 8], strides = [1, 1, 1]} : vector<2x1x8xf32> to vector<1x1x8xf32>
    %162 = vector.shape_cast %161 : vector<1x1x8xf32> to vector<1x8xf32>
    %163 = vector.broadcast %162 : vector<1x8xf32> to vector<8x8xf32>
    %164 = arith.addf %160, %163 : vector<8x8xf32>
    %cst_55 = arith.constant dense<0xFF800000> : vector<8xf32>
    %165 = vector.multi_reduction <maximumf>, %164, %cst_55 [1] : vector<8x8xf32> to vector<8xf32>
    %166 = vector.shape_cast %165 : vector<8xf32> to vector<8x1xf32>
    %167 = vector.broadcast %166 : vector<8x1xf32> to vector<8x8xf32>
    %168 = arith.subf %164, %167 : vector<8x8xf32>
    %169 = math.exp %168 : vector<8x8xf32>
    %cst_56 = arith.constant dense<0.000000e+00> : vector<8xf32>
    %170 = vector.multi_reduction <add>, %169, %cst_56 [1] : vector<8x8xf32> to vector<8xf32>
    %171 = vector.shape_cast %170 : vector<8xf32> to vector<8x1xf32>
    %172 = tpu.reciprocal %171 {approx = true} : vector<8x1xf32> -> vector<8x1xf32>
    %173 = vector.broadcast %172 : vector<8x1xf32> to vector<8x8xf32>
    %174 = arith.mulf %169, %173 : vector<8x8xf32>
    %175 = arith.truncf %174 : vector<8x8xf32> to vector<8x8xbf16>
    %cst_57 = arith.constant dense<0.000000e+00> : vector<8x8xf32>
    %176 = tpu.matmul %175, %159, %cst_57 {dimension_numbers = #tpu.dot_dimension_numbers<[1], [0], [0], [1], [0, 0, 1, 1], [], []>} : vector<8x8xbf16>, vector<8x8xbf16>, vector<8x8xf32> -> vector<8x8xf32>
    %177 = arith.truncf %176 : vector<8x8xf32> to vector<8x8xbf16>
    %c8_58 = arith.constant 8 : index
    %c16_59 = arith.constant 16 : index
    %178 = vector.load %arg19[%c8_58, %c16_59] : memref<16x32xbf16, #tpu.memory_space<vmem>>, vector<8x8xbf16>
    tpu.vector_store %arg19[%c8_58, %c16_59], %177 {strides = array<i32>} : memref<16x32xbf16, #tpu.memory_space<vmem>>, vector<8x8xbf16>,
    %179 = vector.extract_strided_slice %13 {offsets = [0, 24], sizes = [8, 8], strides = [1, 1]} : vector<16x32xf32> to vector<8x8xf32>
    %180 = arith.truncf %179 : vector<8x8xf32> to vector<8x8xbf16>
    %181 = vector.extract_strided_slice %20 {offsets = [0, 24], sizes = [8, 8], strides = [1, 1]} : vector<16x32xf32> to vector<8x8xf32>
    %182 = arith.truncf %181 : vector<8x8xf32> to vector<8x8xbf16>
    %183 = vector.extract_strided_slice %27 {offsets = [0, 24], sizes = [8, 8], strides = [1, 1]} : vector<16x32xf32> to vector<8x8xf32>
    %184 = arith.truncf %183 : vector<8x8xf32> to vector<8x8xbf16>
    %cst_60 = arith.constant dense<0.000000e+00> : vector<8x8xf32>
    %185 = tpu.matmul %180, %182, %cst_60 {dimension_numbers = #tpu.dot_dimension_numbers<[1], [1], [0], [0], [0, 0, 1, 0], [], []>} : vector<8x8xbf16>, vector<8x8xbf16>, vector<8x8xf32> -> vector<8x8xf32>
    %186 = vector.extract_strided_slice %28 {offsets = [0, 0, 0], sizes = [1, 1, 8], strides = [1, 1, 1]} : vector<2x1x8xf32> to vector<1x1x8xf32>
    %187 = vector.shape_cast %186 : vector<1x1x8xf32> to vector<1x8xf32>
    %188 = vector.broadcast %187 : vector<1x8xf32> to vector<8x8xf32>
    %189 = arith.addf %185, %188 : vector<8x8xf32>
    %cst_61 = arith.constant dense<0xFF800000> : vector<8xf32>
    %190 = vector.multi_reduction <maximumf>, %189, %cst_61 [1] : vector<8x8xf32> to vector<8xf32>
    %191 = vector.shape_cast %190 : vector<8xf32> to vector<8x1xf32>
    %192 = vector.broadcast %191 : vector<8x1xf32> to vector<8x8xf32>
    %193 = arith.subf %189, %192 : vector<8x8xf32>
    %194 = math.exp %193 : vector<8x8xf32>
    %cst_62 = arith.constant dense<0.000000e+00> : vector<8xf32>
    %195 = vector.multi_reduction <add>, %194, %cst_62 [1] : vector<8x8xf32> to vector<8xf32>
    %196 = vector.shape_cast %195 : vector<8xf32> to vector<8x1xf32>
    %197 = tpu.reciprocal %196 {approx = true} : vector<8x1xf32> -> vector<8x1xf32>
    %198 = vector.broadcast %197 : vector<8x1xf32> to vector<8x8xf32>
    %199 = arith.mulf %194, %198 : vector<8x8xf32>
    %200 = arith.truncf %199 : vector<8x8xf32> to vector<8x8xbf16>
    %cst_63 = arith.constant dense<0.000000e+00> : vector<8x8xf32>
    %201 = tpu.matmul %200, %184, %cst_63 {dimension_numbers = #tpu.dot_dimension_numbers<[1], [0], [0], [1], [0, 0, 1, 1], [], []>} : vector<8x8xbf16>, vector<8x8xbf16>, vector<8x8xf32> -> vector<8x8xf32>
    %202 = arith.truncf %201 : vector<8x8xf32> to vector<8x8xbf16>
    %c0_64 = arith.constant 0 : index
    %c24 = arith.constant 24 : index
    %203 = vector.load %arg19[%c0_64, %c24] : memref<16x32xbf16, #tpu.memory_space<vmem>>, vector<8x8xbf16>
    tpu.vector_store %arg19[%c0_64, %c24], %202 {strides = array<i32>} : memref<16x32xbf16, #tpu.memory_space<vmem>>, vector<8x8xbf16>,
    %204 = vector.extract_strided_slice %13 {offsets = [8, 24], sizes = [8, 8], strides = [1, 1]} : vector<16x32xf32> to vector<8x8xf32>
    %205 = arith.truncf %204 : vector<8x8xf32> to vector<8x8xbf16>
    %206 = vector.extract_strided_slice %20 {offsets = [8, 24], sizes = [8, 8], strides = [1, 1]} : vector<16x32xf32> to vector<8x8xf32>
    %207 = arith.truncf %206 : vector<8x8xf32> to vector<8x8xbf16>
    %208 = vector.extract_strided_slice %27 {offsets = [8, 24], sizes = [8, 8], strides = [1, 1]} : vector<16x32xf32> to vector<8x8xf32>
    %209 = arith.truncf %208 : vector<8x8xf32> to vector<8x8xbf16>
    %cst_65 = arith.constant dense<0.000000e+00> : vector<8x8xf32>
    %210 = tpu.matmul %205, %207, %cst_65 {dimension_numbers = #tpu.dot_dimension_numbers<[1], [1], [0], [0], [0, 0, 1, 0], [], []>} : vector<8x8xbf16>, vector<8x8xbf16>, vector<8x8xf32> -> vector<8x8xf32>
    %211 = vector.extract_strided_slice %28 {offsets = [1, 0, 0], sizes = [1, 1, 8], strides = [1, 1, 1]} : vector<2x1x8xf32> to vector<1x1x8xf32>
    %212 = vector.shape_cast %211 : vector<1x1x8xf32> to vector<1x8xf32>
    %213 = vector.broadcast %212 : vector<1x8xf32> to vector<8x8xf32>
    %214 = arith.addf %210, %213 : vector<8x8xf32>
    %cst_66 = arith.constant dense<0xFF800000> : vector<8xf32>
    %215 = vector.multi_reduction <maximumf>, %214, %cst_66 [1] : vector<8x8xf32> to vector<8xf32>
    %216 = vector.shape_cast %215 : vector<8xf32> to vector<8x1xf32>
    %217 = vector.broadcast %216 : vector<8x1xf32> to vector<8x8xf32>
    %218 = arith.subf %214, %217 : vector<8x8xf32>
    %219 = math.exp %218 : vector<8x8xf32>
    %cst_67 = arith.constant dense<0.000000e+00> : vector<8xf32>
    %220 = vector.multi_reduction <add>, %219, %cst_67 [1] : vector<8x8xf32> to vector<8xf32>
    %221 = vector.shape_cast %220 : vector<8xf32> to vector<8x1xf32>
    %222 = tpu.reciprocal %221 {approx = true} : vector<8x1xf32> -> vector<8x1xf32>
    %223 = vector.broadcast %222 : vector<8x1xf32> to vector<8x8xf32>
    %224 = arith.mulf %219, %223 : vector<8x8xf32>
    %225 = arith.truncf %224 : vector<8x8xf32> to vector<8x8xbf16>
    %cst_68 = arith.constant dense<0.000000e+00> : vector<8x8xf32>
    %226 = tpu.matmul %225, %209, %cst_68 {dimension_numbers = #tpu.dot_dimension_numbers<[1], [0], [0], [1], [0, 0, 1, 1], [], []>} : vector<8x8xbf16>, vector<8x8xbf16>, vector<8x8xf32> -> vector<8x8xf32>
    %227 = arith.truncf %226 : vector<8x8xf32> to vector<8x8xbf16>
    %c8_69 = arith.constant 8 : index
    %c24_70 = arith.constant 24 : index
    %228 = vector.load %arg19[%c8_69, %c24_70] : memref<16x32xbf16, #tpu.memory_space<vmem>>, vector<8x8xbf16>
    tpu.vector_store %arg19[%c8_69, %c24_70], %227 {strides = array<i32>} : memref<16x32xbf16, #tpu.memory_space<vmem>>, vector<8x8xbf16>,
    %c0_71 = arith.constant 0 : index
    %c0_72 = arith.constant 0 : index
    %229 = vector.load %arg19[%c0_71, %c0_72] : memref<16x32xbf16, #tpu.memory_space<vmem>>, vector<16x32xbf16>
    %c0_73 = arith.constant 0 : index
    %c0_74 = arith.constant 0 : index
    %c0_75 = arith.constant 0 : index
    %230 = vector.load %arg10[%c0_73, %c0_74, %c0_75] : memref<1x32x32xbf16, #tpu.memory_space<vmem>>, vector<1x32x32xbf16>
    %231 = vector.shape_cast %230 : vector<1x32x32xbf16> to vector<32x32xbf16>
    %cst_76 = arith.constant dense<0.000000e+00> : vector<16x32xf32>
    %232 = tpu.matmul %229, %231, %cst_76 {dimension_numbers = #tpu.dot_dimension_numbers<[1], [0], [0], [1], [0, 0, 1, 1], [], []>} : vector<16x32xbf16>, vector<32x32xbf16>, vector<16x32xf32> -> vector<16x32xf32>
    %c0_77 = arith.constant 0 : index
    %c0_78 = arith.constant 0 : index
    %c0_79 = arith.constant 0 : index
    %233 = vector.load %arg11[%c0_77, %c0_78, %c0_79] : memref<1x1x32xf32, #tpu.memory_space<vmem>>, vector<1x1x32xf32>
    %234 = vector.shape_cast %233 : vector<1x1x32xf32> to vector<1x32xf32>
    %235 = vector.broadcast %234 : vector<1x32xf32> to vector<16x32xf32>
    %236 = arith.addf %232, %235 : vector<16x32xf32>
    %c0_80 = arith.constant 0 : index
    %c0_81 = arith.constant 0 : index
    %c0_82 = arith.constant 0 : index
    %237 = vector.load %arg12[%c0_80, %c0_81, %c0_82] : memref<1x1x32xf32, #tpu.memory_space<vmem>>, vector<1x1x32xf32>
    %238 = vector.shape_cast %237 : vector<1x1x32xf32> to vector<1x32xf32>
    %c0_83 = arith.constant 0 : index
    %c0_84 = arith.constant 0 : index
    %c0_85 = arith.constant 0 : index
    %239 = vector.load %arg13[%c0_83, %c0_84, %c0_85] : memref<1x1x32xf32, #tpu.memory_space<vmem>>, vector<1x1x32xf32>
    %240 = vector.shape_cast %239 : vector<1x1x32xf32> to vector<1x32xf32>
    %241 = arith.addf %3, %236 : vector<16x32xf32>
    %cst_86 = arith.constant dense<0.000000e+00> : vector<16xf32>
    %242 = vector.multi_reduction <add>, %241, %cst_86 [1] : vector<16x32xf32> to vector<16xf32>
    %243 = vector.shape_cast %242 : vector<16xf32> to vector<16x1xf32>
    %cst_87 = arith.constant 3.200000e+01 : f32
    %244 = vector.broadcast %cst_87 : f32 to vector<16x1xf32>
    %245 = arith.divf %243, %244 : vector<16x1xf32>
    %246 = vector.broadcast %245 : vector<16x1xf32> to vector<16x32xf32>
    %247 = arith.subf %241, %246 : vector<16x32xf32>
    %248 = arith.mulf %247, %247 : vector<16x32xf32>
    %cst_88 = arith.constant dense<0.000000e+00> : vector<16xf32>
    %249 = vector.multi_reduction <add>, %248, %cst_88 [1] : vector<16x32xf32> to vector<16xf32>
    %250 = vector.shape_cast %249 : vector<16xf32> to vector<16x1xf32>
    %cst_89 = arith.constant 3.200000e+01 : f32
    %251 = vector.broadcast %cst_89 : f32 to vector<16x1xf32>
    %252 = arith.divf %250, %251 : vector<16x1xf32>
    %253 = vector.broadcast %245 : vector<16x1xf32> to vector<16x32xf32>
    %254 = arith.subf %241, %253 : vector<16x32xf32>
    %cst_90 = arith.constant 9.99999974E-6 : f32
    %255 = vector.broadcast %cst_90 : f32 to vector<16x1xf32>
    %256 = arith.addf %252, %255 : vector<16x1xf32>
    %257 = math.rsqrt %256 : vector<16x1xf32>
    %258 = vector.broadcast %257 : vector<16x1xf32> to vector<16x32xf32>
    %259 = arith.mulf %254, %258 : vector<16x32xf32>
    %260 = vector.broadcast %238 : vector<1x32xf32> to vector<16x32xf32>
    %261 = arith.mulf %259, %260 : vector<16x32xf32>
    %262 = vector.broadcast %240 : vector<1x32xf32> to vector<16x32xf32>
    %263 = arith.addf %261, %262 : vector<16x32xf32>
    %264 = arith.truncf %263 : vector<16x32xf32> to vector<16x32xbf16>
    %c0_91 = arith.constant 0 : index
    %c0_92 = arith.constant 0 : index
    %c0_93 = arith.constant 0 : index
    %265 = vector.load %arg14[%c0_91, %c0_92, %c0_93] : memref<1x32x64xbf16, #tpu.memory_space<vmem>>, vector<1x32x64xbf16>
    %266 = vector.shape_cast %265 : vector<1x32x64xbf16> to vector<32x64xbf16>
    %cst_94 = arith.constant dense<0.000000e+00> : vector<16x64xf32>
    %267 = tpu.matmul %264, %266, %cst_94 {dimension_numbers = #tpu.dot_dimension_numbers<[1], [0], [0], [1], [0, 0, 1, 1], [], []>} : vector<16x32xbf16>, vector<32x64xbf16>, vector<16x64xf32> -> vector<16x64xf32>
    %c0_95 = arith.constant 0 : index
    %c0_96 = arith.constant 0 : index
    %c0_97 = arith.constant 0 : index
    %268 = vector.load %arg15[%c0_95, %c0_96, %c0_97] : memref<1x1x64xf32, #tpu.memory_space<vmem>>, vector<1x1x64xf32>
    %269 = vector.shape_cast %268 : vector<1x1x64xf32> to vector<1x64xf32>
    %270 = vector.broadcast %269 : vector<1x64xf32> to vector<16x64xf32>
    %271 = arith.addf %267, %270 : vector<16x64xf32>
    %cst_98 = arith.constant 0.000000e+00 : f32
    %272 = vector.broadcast %cst_98 : f32 to vector<16x64xf32>
    %273 = arith.maximumf %271, %272 : vector<16x64xf32>
    %274 = arith.truncf %273 : vector<16x64xf32> to vector<16x64xbf16>
    %c0_99 = arith.constant 0 : index
    %c0_100 = arith.constant 0 : index
    %c0_101 = arith.constant 0 : index
    %275 = vector.load %arg16[%c0_99, %c0_100, %c0_101] : memref<1x64x32xbf16, #tpu.memory_space<vmem>>, vector<1x64x32xbf16>
    %276 = vector.shape_cast %275 : vector<1x64x32xbf16> to vector<64x32xbf16>
    %cst_102 = arith.constant dense<0.000000e+00> : vector<16x32xf32>
    %277 = tpu.matmul %274, %276, %cst_102 {dimension_numbers = #tpu.dot_dimension_numbers<[1], [0], [0], [1], [0, 0, 1, 1], [], []>} : vector<16x64xbf16>, vector<64x32xbf16>, vector<16x32xf32> -> vector<16x32xf32>
    %c0_103 = arith.constant 0 : index
    %c0_104 = arith.constant 0 : index
    %c0_105 = arith.constant 0 : index
    %278 = vector.load %arg17[%c0_103, %c0_104, %c0_105] : memref<1x1x32xf32, #tpu.memory_space<vmem>>, vector<1x1x32xf32>
    %279 = vector.shape_cast %278 : vector<1x1x32xf32> to vector<1x32xf32>
    %280 = vector.broadcast %279 : vector<1x32xf32> to vector<16x32xf32>
    %281 = arith.addf %277, %280 : vector<16x32xf32>
    %282 = arith.addf %263, %281 : vector<16x32xf32>
    %cst_106 = arith.constant dense<0.000000e+00> : vector<16xf32>
    %283 = vector.multi_reduction <add>, %282, %cst_106 [1] : vector<16x32xf32> to vector<16xf32>
    %284 = vector.shape_cast %283 : vector<16xf32> to vector<16x1xf32>
    %cst_107 = arith.constant 3.200000e+01 : f32
    %285 = vector.broadcast %cst_107 : f32 to vector<16x1xf32>
    %286 = arith.divf %284, %285 : vector<16x1xf32>
    %287 = vector.broadcast %286 : vector<16x1xf32> to vector<16x32xf32>
    %288 = arith.subf %282, %287 : vector<16x32xf32>
    %289 = arith.mulf %288, %288 : vector<16x32xf32>
    %cst_108 = arith.constant dense<0.000000e+00> : vector<16xf32>
    %290 = vector.multi_reduction <add>, %289, %cst_108 [1] : vector<16x32xf32> to vector<16xf32>
    %291 = vector.shape_cast %290 : vector<16xf32> to vector<16x1xf32>
    %cst_109 = arith.constant 3.200000e+01 : f32
    %292 = vector.broadcast %cst_109 : f32 to vector<16x1xf32>
    %293 = arith.divf %291, %292 : vector<16x1xf32>
    %294 = vector.broadcast %286 : vector<16x1xf32> to vector<16x32xf32>
    %295 = arith.subf %282, %294 : vector<16x32xf32>
    %cst_110 = arith.constant 9.99999974E-6 : f32
    %296 = vector.broadcast %cst_110 : f32 to vector<16x1xf32>
    %297 = arith.addf %293, %296 : vector<16x1xf32>
    %298 = math.rsqrt %297 : vector<16x1xf32>
    %299 = vector.broadcast %298 : vector<16x1xf32> to vector<16x32xf32>
    %300 = arith.mulf %295, %299 : vector<16x32xf32>
    %301 = vector.broadcast %238 : vector<1x32xf32> to vector<16x32xf32>
    %302 = arith.mulf %300, %301 : vector<16x32xf32>
    %303 = vector.broadcast %240 : vector<1x32xf32> to vector<16x32xf32>
    %304 = arith.addf %302, %303 : vector<16x32xf32>
    %c0_111 = arith.constant 0 : index
    %c0_112 = arith.constant 0 : index
    %305 = vector.load %arg18[%c0_111, %c0_112] : memref<16x32xf32, #tpu.memory_space<vmem>>, vector<16x32xf32>
    tpu.vector_store %arg18[%c0_111, %c0_112], %304 {strides = array<i32>} : memref<16x32xf32, #tpu.memory_space<vmem>>, vector<16x32xf32>,
    return
  }
  func.func @transform_0(%arg0: i32, %arg1: i32) -> (i32, i32, i32) {
    %c0_i32 = arith.constant 0 : i32
    %c0_i32_0 = arith.constant 0 : i32
    %c0_i32_1 = arith.constant 0 : i32
    return %arg0, %c0_i32, %c0_i32_0 : i32, i32, i32
  }
  func.func @transform_1(%arg0: i32, %arg1: i32) -> (i32, i32) {
    %c0_i32 = arith.constant 0 : i32
    %c0_i32_0 = arith.constant 0 : i32
    return %arg0, %c0_i32 : i32, i32
  }
  func.func @transform_2(%arg0: i32, %arg1: i32) -> (i32, i32, i32) {
    %c0_i32 = arith.constant 0 : i32
    %c0_i32_0 = arith.constant 0 : i32
    %c0_i32_1 = arith.constant 0 : i32
    return %arg1, %c0_i32, %c0_i32_0 : i32, i32, i32
  }
  func.func @transform_3(%arg0: i32, %arg1: i32) -> (i32, i32, i32) {
    %c0_i32 = arith.constant 0 : i32
    %c0_i32_0 = arith.constant 0 : i32
    %c0_i32_1 = arith.constant 0 : i32
    return %arg1, %c0_i32, %c0_i32_0 : i32, i32, i32
  }
  func.func @transform_4(%arg0: i32, %arg1: i32) -> (i32, i32, i32) {
    %c0_i32 = arith.constant 0 : i32
    %c0_i32_0 = arith.constant 0 : i32
    %c0_i32_1 = arith.constant 0 : i32
    return %arg1, %c0_i32, %c0_i32_0 : i32, i32, i32
  }
  func.func @transform_5(%arg0: i32, %arg1: i32) -> (i32, i32, i32) {
    %c0_i32 = arith.constant 0 : i32
    %c0_i32_0 = arith.constant 0 : i32
    %c0_i32_1 = arith.constant 0 : i32
    return %arg1, %c0_i32, %c0_i32_0 : i32, i32, i32
  }
  func.func @transform_6(%arg0: i32, %arg1: i32) -> (i32, i32, i32) {
    %c0_i32 = arith.constant 0 : i32
    %c0_i32_0 = arith.constant 0 : i32
    %c0_i32_1 = arith.constant 0 : i32
    return %arg1, %c0_i32, %c0_i32_0 : i32, i32, i32
  }
  func.func @transform_7(%arg0: i32, %arg1: i32) -> (i32, i32, i32) {
    %c0_i32 = arith.constant 0 : i32
    %c0_i32_0 = arith.constant 0 : i32
    %c0_i32_1 = arith.constant 0 : i32
    return %arg1, %c0_i32, %c0_i32_0 : i32, i32, i32
  }
  func.func @transform_8(%arg0: i32, %arg1: i32) -> (i32, i32, i32) {
    %c0_i32 = arith.constant 0 : i32
    %c0_i32_0 = arith.constant 0 : i32
    %c0_i32_1 = arith.constant 0 : i32
    return %arg1, %c0_i32, %c0_i32_0 : i32, i32, i32
  }
  func.func @transform_9(%arg0: i32, %arg1: i32) -> (i32, i32, i32) {
    %c0_i32 = arith.constant 0 : i32
    %c0_i32_0 = arith.constant 0 : i32
    %c0_i32_1 = arith.constant 0 : i32
    return %arg1, %c0_i32, %c0_i32_0 : i32, i32, i32
  }
  func.func @transform_10(%arg0: i32, %arg1: i32) -> (i32, i32, i32) {
    %c0_i32 = arith.constant 0 : i32
    %c0_i32_0 = arith.constant 0 : i32
    %c0_i32_1 = arith.constant 0 : i32
    return %arg1, %c0_i32, %c0_i32_0 : i32, i32, i32
  }
  func.func @transform_11(%arg0: i32, %arg1: i32) -> (i32, i32, i32) {
    %c0_i32 = arith.constant 0 : i32
    %c0_i32_0 = arith.constant 0 : i32
    %c0_i32_1 = arith.constant 0 : i32
    return %arg1, %c0_i32, %c0_i32_0 : i32, i32, i32
  }
  func.func @transform_12(%arg0: i32, %arg1: i32) -> (i32, i32, i32) {
    %c0_i32 = arith.constant 0 : i32
    %c0_i32_0 = arith.constant 0 : i32
    %c0_i32_1 = arith.constant 0 : i32
    return %arg1, %c0_i32, %c0_i32_0 : i32, i32, i32
  }
  func.func @transform_13(%arg0: i32, %arg1: i32) -> (i32, i32, i32) {
    %c0_i32 = arith.constant 0 : i32
    %c0_i32_0 = arith.constant 0 : i32
    %c0_i32_1 = arith.constant 0 : i32
    return %arg1, %c0_i32, %c0_i32_0 : i32, i32, i32
  }
  func.func @transform_14(%arg0: i32, %arg1: i32) -> (i32, i32, i32) {
    %c0_i32 = arith.constant 0 : i32
    %c0_i32_0 = arith.constant 0 : i32
    %c0_i32_1 = arith.constant 0 : i32
    return %arg1, %c0_i32, %c0_i32_0 : i32, i32, i32
  }
  func.func @transform_15(%arg0: i32, %arg1: i32) -> (i32, i32, i32) {
    %c0_i32 = arith.constant 0 : i32
    %c0_i32_0 = arith.constant 0 : i32
    %c0_i32_1 = arith.constant 0 : i32
    return %arg1, %c0_i32, %c0_i32_0 : i32, i32, i32
  }
  func.func @transform_16(%arg0: i32, %arg1: i32) -> (i32, i32) {
    %c0_i32 = arith.constant 0 : i32
    %c0_i32_0 = arith.constant 0 : i32
    return %arg0, %c0_i32 : i32, i32
  }
}

</mosaic_0001>

<bundles_post_ra>
// kernel: encoder_forward.1
= control target key start
LH: loop header
LB: loop body
LE: loop exit
PB: predicated region body
PF: predicated region fallthrough
CT: control target
= control target key end

     0   :  { %s3597_s0 = inlined_call_operand.vmem [shape: f32[4,1,8], index: 0, kind: input, shape index: {}]   ;;  %s3598_s1 = inlined_call_operand.vmem [shape: f32[32,32], index: 1, kind: input, shape index: {}]   ;;  %s3599_s2 = inlined_call_operand.vmem [shape: bf16[2,32,32], index: 2, kind: input, shape index: {}]   ;;  %s3600_s3 = inlined_call_operand.vmem [shape: f32[2,1,32], index: 3, kind: input, shape index: {}]   ;;  %s3601_s4 = inlined_call_operand.vmem [shape: bf16[2,32,32], index: 4, kind: input, shape index: {}]   ;;  %s3602_s5 = inlined_call_operand.vmem [shape: f32[2,1,32], index: 5, kind: input, shape index: {}]   ;;  %s3603_s6 = inlined_call_operand.vmem [shape: bf16[2,32,32], index: 6, kind: input, shape index: {}]   ;;  %s3604_s7 = inlined_call_operand.vmem [shape: f32[2,1,32], index: 7, kind: input, shape index: {}]   ;;  %s3605_s8 = inlined_call_operand.vmem [shape: bf16[2,32,32], index: 8, kind: input, shape index: {}]   ;;  %s3606_s9 = inlined_call_operand.vmem [shape: f32[2,1,32], index: 9, kind: input, shape index: {}]   ;;  %s3607_s10 = inlined_call_operand.vmem [shape: f32[2,1,32], index: 10, kind: input, shape index: {}]   ;;  %s3608_s11 = inlined_call_operand.vmem [shape: f32[2,1,32], index: 11, kind: input, shape index: {}]   ;;  %s3609_s12 = inlined_call_operand.vmem [shape: bf16[2,32,64], index: 12, kind: input, shape index: {}]   ;;  %s3610_s13 = inlined_call_operand.vmem [shape: f32[2,1,64], index: 13, kind: input, shape index: {}]   ;;  %s3611_s14 = inlined_call_operand.vmem [shape: bf16[2,64,32], index: 14, kind: input, shape index: {}]   ;;  %s3612_s15 = inlined_call_operand.vmem [shape: f32[2,1,32], index: 15, kind: input, shape index: {}]   ;;  %s3613_s16 = inlined_call_operand.hbm [shape: f32[32,32], index: 16, kind: output, shape index: {}]  }
   0x1   :  { %3631 = sst [smem:[#allocation21_spill]] %s3597_s0 }
   0x2   :  { %3632 = sst [smem:[#allocation22_spill]] %s3598_s1 }
   0x3   :  { %3633 = sst [smem:[#allocation23_spill]] %s3599_s2 }
   0x4   :  { %3634 = sst [smem:[#allocation24_spill]] %s3601_s4 }
   0x5   :  { %3635 = sst [smem:[#allocation25_spill]] %s3603_s6 }
   0x6   :  { %3636 = sst [smem:[#allocation26_spill]] %s3605_s8 }
   0x7   :  { %3637 = sst [smem:[#allocation27_spill]] %s3606_s9 }
   0x8   :  { %3638 = sst [smem:[#allocation28_spill]] %s3607_s10 }
   0x9   :  { %3639 = sst [smem:[#allocation29_spill]] %s3611_s14 }
   0xa   :  { %3640 = sst [smem:[#allocation30_spill]] %s3612_s15 }
   0xb   :  { %3641 = sst [smem:[#allocation31_spill]] %s3613_s16 }
   0xc   :  { %21 = vsyncpa [#allocation4], 0 }
   0xd   :  { %23 = vsyncpa [#allocation4 + $0x1], 0  ;;  %s3096_s21 = smov 0   ;;  %s3098_s22 = smov 0  }
   0xe   :  { %s3100_s23 = smov 0   ;;  %s3102_s24 = smov 0  }
   0xf   :  { %s3104_s25 = smov 0   ;;  %s3106_s26 = smov 0  }
  0x10   :  { %s3108_s27 = smov 0   ;;  %s3110_s28 = smov 0  }
  0x11 LB: > { %3642 = sst [smem:[#allocation6_spill]] %s2971_s21  ;;  %s2491_s29 = sadd.s32 4294967295, %s2999_s28   ;;  %s2999_s28 = sphi %s3110_s28, %s29_s28   ;;  %s2995_s27 = sphi %s3108_s27, %s3694_s27   ;;  %s2991_s26 = sphi %s3106_s26, %s3693_s26   ;;  %s2987_s25 = sphi %s3104_s25, %s3692_s25   ;;  %s2983_s24 = sphi %s3102_s24, %s3691_s24   ;;  %s2979_s23 = sphi %s3100_s23, %s3690_s23   ;;  %s2975_s22 = sphi %s3098_s22, %s3689_s22   ;;  %s2971_s21 = sphi %s3096_s21, %s3688_s21  }
  0x12   : > { %3643 = sst [smem:[#allocation7_spill]] %s2975_s22  ;;  %s2492_s30 = sadd.s32 4294967294, %s2999_s28  }
  0x13   : > { %3644 = sst [smem:[#allocation8_spill]] %s2979_s23  ;;  %s38_s0 = sadd.s32 1, %s2991_s26 }
  0x14   : > { %3645 = sst [smem:[#allocation9_spill]] %s2983_s24  ;;  %p39_p0 = scmp.ge.s32.totalorder %s38_s0, 2 }
  0x15   : > { %3646 = sst [smem:[#allocation10_spill]] %s2987_s25  ;;  %s41_s17 = sadd.s32 1, %s2995_s27 }
  0x16   : > { %3647 = sst [smem:[#allocation11_spill]] %s2991_s26  ;;  %p474_p1 = scmp.ne.s32.totalorder %s2979_s23, %s2975_s22 }
  0x17   : > { %3648 = sst [smem:[#allocation12_spill]] %s2995_s27  ;;  %p475_p2 = scmp.eq.s32.totalorder %s2491_s29, 3 }
  0x18   : > { %3649 = sst [smem:[#allocation13_spill]] %s2999_s28  ;;  %s3696_s0 = smov (%p39_p0, %s38_s0), 0 }
  0x19   : > { %3650 = sst [smem:[#allocation14_spill]] %s3696_s0  ;;  %s3698_s17 = smov (!%p39_p0, %s41_s17), %s2995_s27 }
  0x1a   : > { %p3145_p3 = por %p475_p2, %p474_p1  ;;  %p480_p4 = scmp.ne.s32.totalorder %s2975_s22, %s2971_s21 }
  0x1b   : > { %p43_p5 = scmp.ge.s32.totalorder %s3698_s17, 2  ;;  %p481_p6 = scmp.eq.s32.totalorder %s2492_s30, 3 }
  0x1c   : > { %s3651_s18 = scalar_select %p3145_p3, 1, 0 }
  0x1d   : > { %p2495_p7 = scmp.ge.s32.totalorder %s2999_s28, 1  ;;  %p612_p8 = scmp.lt.s32.totalorder %s2999_s28, 5 }
  0x1e   : > { %3652 = sst [smem:[#allocation15_spill]] %s3651_s18  ;;  %s3700_s17 = smov (%p43_p5, %s3698_s17), 0 }
  0x1f   : > { %3653 = sst [smem:[#allocation16_spill]] %s3700_s17  ;;  %p3155_p9 = por %p481_p6, %p480_p4 }
  0x20   : > { %p613_p10 = pnand %p2495_p7, %p612_p8  ;;  %s461_s20 = ssub.s32 %s2995_s27, %s3700_s17 }
  0x21   : > { %s3654_s19 = scalar_select %p3155_p9, 1, 0 }
  0x22   : > { %s464_s29 = sadd.s32 1, %s2979_s23  ;;  %p462_p11 = scmp.eq.s32.totalorder %s461_s20, 0 }
  0x23   : > { %3655 = sst [smem:[#allocation17_spill]] %s3654_s19  ;;  %616 = sbr.rel (%p613_p10) target bundleno = 2672 (0xa70), region = 84 }
  0x24   : > { %s3163_s0 = scalar_select %p462_p11, %s2979_s23, %s464_s29  }
  0x26   : > { %3656 = sst [smem:[#allocation18_spill]] %s3163_s0 }
  0x2a   : > { %s3619_s30 = sand.u32 1, %s2975_s22   ;;  %s2497_s26 = sshll.u32 %s2987_s25, 1 }
  0x2b   : > { %s2496_s21 = sshll.u32 %s3619_s30, 4  ;;  %p721_p12 = scmp.lt.s32.totalorder %s2497_s26, 3 }
  0x2c   : > { %p731_p13 = scmp.lt.s32.totalorder %s2983_s24, 1  ;;  %s3657_s20 = sld [smem:[#allocation21_spill]] }
  0x2d   : > { %s3702_s26 = smov (!%p721_p12, %s2497_s26), 3  ;;  %s3659_s1 = sld [smem:[#allocation22_spill]] }
  0x2e   : > { %s3171_s19 = scalar_select %p731_p13, %s2983_s24, 1 }
  0x2f   : > { %s2499_s30 = sshll.u32 %s3702_s26, 3  ;;  %s3660_s2 = sld [smem:[#allocation23_spill]] }
  0x30   : > { %s2564_s16 = sshll.u32 %s3171_s19, 4  ;;  %s3662_s4 = sld [smem:[#allocation24_spill]] }
  0x31   : > { %s3663_s6 = sld [smem:[#allocation25_spill]]  ;;  %s3664_s8 = sld [smem:[#allocation26_spill]] }
  0x32   : > { %s3176_s29 = scalar_lea.vmem %s3657_s20, %s3702_s26  ;;  %s3227_s27 = scalar_lea.vmem %s3609_s12, %s2564_s16 }
  0x33   : > { %3658 = sst [smem:[#allocation19_spill]] %s3176_s29  ;;  %s729_s28 = scalar_lea.vmem %s3659_s1, %s2499_s30 }
  0x34   : > { %s3667_s24 = sld [smem:[#allocation30_spill]]  ;;  %s3668_s23 = sld [smem:[#allocation29_spill]] }
  0x35   : > { %s3185_s17 = scalar_lea.vmem %s3660_s2, %s2564_s16  ;;  %s776_s2 = scalar_lea.vmem %s3610_s13, %s3171_s19 }
  0x36   : > { %3661 = sst [smem:[#allocation20_spill]] %s3185_s17  ;;  %s743_s29 = scalar_lea.vmem %s3662_s4, %s2564_s16 }
  0x37   : > { %s3201_s1 = scalar_lea.vmem %s3663_s6, %s2564_s16  ;;  %s3210_s25 = scalar_lea.vmem %s3664_s8, %s2564_s16 }
  0x38   : > { %s768_s4 = scalar_lea.vmem %s3608_s11, %s3171_s19  ;;  %s2569_s8 = sshll.u32 %s3171_s19, 5 }
  0x39   : > { %s3243_s0 = scalar_lea.vmem [#allocation3], %s2496_s21  ;;  %s3669_s30 = sld [smem:[#allocation9_spill]] }
  0x3a   : > { %s784_s9 = scalar_lea.vmem %s3667_s24, %s3171_s19  ;;  %s3241_s10 = scalar_lea.vmem %s3668_s23, %s2569_s8 }
  0x3f   : > { %p2512_p0 = scmp.ne.s32.totalorder %s3669_s30, 0 }
  0x40   : > { %v791_v0 = vld [vmem:[%s729_s28] sm:$0xff] (!%p2512_p0)  ;;  %vm793_vm0 = vcmask (!%p2512_p0), 261120   ;;  %v792_v1 = vld [vmem:[%s729_s28 + $0x8] sm:$0xff] (!%p2512_p0) }
  0x41   : > { %790 = sbr.rel (%p2512_p0) target bundleno = 72 (0x48), region = 88  ;;  %794 = vst.msk [vmem:[%s3243_s0] sm:$0xff] (!%p2512_p0), %vm793_vm0, %v791_v0  ;;  %795 = vst.msk [vmem:[%s3243_s0 + $0x8] sm:$0xff] (!%p2512_p0), %vm793_vm0, %v792_v1 }
  0x48 PF: > { %v2851_v2 = vld [vmem:[%s743_s29] sm:$0xff]   ;;  %s3670_s6 = sld [smem:[#allocation20_spill]]  ;;  %v3001_v3 = vmov 0.0   ;;  %v2853_v5 = vld [vmem:[%s743_s29 + $0x8] sm:$0xff]   ;;  %vm3002_vm1 = vmmov 0   ;;  %vm822_vm2 = vcmask 261120   ;;  %s3671_s21 = scalar_lea.vmem %s3602_s5, %s3171_s19 }
  0x49   : > { %2631 = vmatprep.subr.bf16.mxu1 %v3001_v3  ;;  %2623 = vmatprep.subr.bf16.mxu0 %v3001_v3  ;;  %v3257_v7 = vld [vmem:[%s3243_s0] sm:$0xff]  ;;  %v3260_v8 = vld [vmem:[%s3243_s0 + $0x8] sm:$0xff]  ;;  %s3672_s29 = scalar_lea.vmem %s3600_s3, %s3171_s19  ;;  %vm1008_vm3 = vcmask 64512   ;;  %s3003_s23 = smov 120   ;;  %vm1070_vm4 = vcmask 1043456   ;;  %vm1115_vm5 = vcmask 60416  }
  0x4a   : > { %2632 = vmatpush3.bf16.msra.mxu1 %v2851_v2  ;;  %2635 = vmatprep.mubr.msk.bf16.mxu1 %vm3002_vm1, %v3001_v3  ;;  %v798_v9 = vpack.c.bf16 %v3260_v8, %v3257_v7  ;;  %v2517_v10 = vld [vmem:[%s3671_s21] ss:$0 sm:$0xff]  ;;  %s3004_s18 = smov 112   ;;  %s3005_s17 = smov 104   ;;  %v2856_v33 = vld [vmem:[%s3201_s1 + $0x8] sm:$0xff]   ;;  %vm1234_vm6 = vcmask 64516  }
  0x4b   : > { %2633 = vmatprep.subr.bf16.mxu1 %v3001_v3  ;;  %2627 = vmatprep.mubr.msk.bf16.mxu0 %vm3002_vm1, %v3001_v3  ;;  %v2513_v11 = vld [vmem:[%s3672_s29] ss:$0 sm:$0xff]  ;;  %s3674_s20 = scalar_lea.vmem %s3604_s7, %s3171_s19  ;;  %s3006_s15 = smov 8   ;;  %vm1354_vm7 = vcmask 126016   ;;  %vm1475_vm8 = vcmask 130116   ;;  %vm1592_vm9 = vcmask 191616  }
  0x4c   : > { %v2855_v32 = vld [vmem:[%s3201_s1] sm:$0xff]   ;;  %s3673_s1 = sld [smem:[#allocation19_spill]]  ;;  %s3007_s26 = smov 16   ;;  %vm1710_vm10 = vcmask 195716   ;;  %vm1827_vm11 = vcmask 257216   ;;  %vm1945_vm12 = vcmask 261316  }
  0x4d   : > { %s3008_s30 = smov 24   ;;  %s3675_s8 = sld [smem:[#allocation27_spill]]  ;;  %vm2172_vm13 = vcmask 523264  }
  0x4e   : > { %v2852_v4 = vld [vmem:[%s3670_s6] sm:$0xff]   ;;  %v2854_v6 = vld [vmem:[%s3670_s6 + $0x8] sm:$0xff]   ;;  %2634 = vmatpush3.bf16.msra.mxu1 %v2853_v5  ;;  %s3677_s24 = sld [smem:[#allocation28_spill]]  ;;  %s2265_s14 = sshll.u32 %s3243_s0, 4  ;;  %s3538_s14 = int_to_ptr.vmem [resolvable:$true] %s2265_s14 }
  0x4f   : > { %2624 = vmatpush3.bf16.msra.mxu0 %v2852_v4  ;;  %2647 = vmatprep.subr.bf16.mxu1 %v3001_v3 }
  0x50   : > { %2625 = vmatprep.subr.bf16.mxu0 %v3001_v3 }
  0x51   : > { %2636 = vmatmul.mubr.msk.bf16.vlgmr.msra.gmra.mrb[0].mxu1 %vm822_vm2, %v798_v9 }
  0x52   : > { %2649 = vmatprep.mubr.msk.bf16.mxu1 %vm3002_vm1, %v3001_v3  ;;  %v2525_v52 = vld [vmem:[%s3673_s1] ss:$0 sm:$0xff]  ;;  %v2528_v59 = vld [vmem:[%s3673_s1 + $0x1] ss:$0 sm:$0xff] }
  0x53   : > { %2626 = vmatpush3.bf16.msra.mxu0 %v2854_v6  ;;  %s3676_s16 = scalar_lea.vmem %s3675_s8, %s3171_s19 }
  0x54   : > { %2639 = vmatprep.subr.bf16.mxu0 %v3001_v3  ;;  %s3678_s28 = scalar_lea.vmem %s3677_s24, %s3171_s19 }
  0x56   : > { %2628 = vmatmul.mubr.msk.bf16.vlgmr.msra.gmra.mrb[0].mxu0 %vm822_vm2, %v798_v9 }
  0x57   : > { %2643 = vmatprep.mubr.msk.bf16.mxu0 %vm3002_vm1, %v3001_v3  ;;  %2640 = vmatpush3.bf16.msra.mxu0 %v2855_v32 }
  0x58   : > { %2641 = vmatprep.subr.bf16.mxu0 %v3001_v3 }
  0x5b   : > { %2642 = vmatpush3.bf16.msra.mxu0 %v2856_v33 }
  0x5c   : > { %2653 = vmatprep.subr.bf16.mxu0 %v3001_v3 }
  0x5e   : > { %2644 = vmatmul.mubr.msk.bf16.vlgmr.msra.gmra.mrb[4].mxu0 %vm822_vm2, %v798_v9 }
  0x5f   : > { %2655 = vmatprep.mubr.msk.bf16.mxu0 %vm3002_vm1, %v3001_v3 }
 0x124   : > { %v926_v12 = vpop.f32.mrb[0].mxu1 }
 0x125   : > { %v927_v13 = vadd.f32 %v2517_v10, %v926_v12  ;;  %v2637_v14 = vpop.f32.mrb[1].mxu1 }
 0x126   : > { %v929_v17 = vpop.f32.mrb[2].mxu1 }
 0x127   : > { %v1000_v19 = vpack.c.bf16 %v927_v13, %v927_v13  ;;  %v930_v20 = vadd.f32 %v2517_v10, %v929_v17  ;;  %v2638_v21 = vpop.f32.mrb[3].mxu1 }
 0x129   : > { %v860_v15 = vpop.f32.mrb[0].mxu0  ;;  %v1118_v26 = vpack.c.bf16 %v930_v20, %v930_v20  ;;  %1240 = vrot.lane.b32.xlu0 %v1000_v19, %s3003_s23  ;;  %v1013_v27 = vsel %vm1008_vm3, %v1000_v19, 0 }
 0x12a   : > { %v861_v16 = vadd.f32 %v2513_v11, %v860_v15  ;;  %v2629_v18 = vpop.f32.mrb[1].mxu0  ;;  %2648 = vmatpush3.bf16.xpose.msra.mxu1 %v1013_v27 }
 0x12b   : > { %v863_v22 = vpop.f32.mrb[2].mxu0  ;;  %1360 = vrot.lane.b32.xlu1 %v1118_v26, %s3003_s23  ;;  %2659 = vmatprep.subr.bf16.mxu1 %v3001_v3  ;;  %v1130_v31 = vsel %vm1008_vm3, %v1118_v26, 0 }
 0x12c   : > { %v867_v23 = vmul.f32 0.35355338, %v861_v16  ;;  %v864_v24 = vadd.f32 %v2513_v11, %v863_v22  ;;  %v2630_v25 = vpop.f32.mrb[3].mxu0 }
 0x12e   : > { %v999_v28 = vpack.c.bf16 %v867_v23, %v867_v23  ;;  %v868_v29 = vmul.f32 0.35355338, %v864_v24 }
 0x130   : > { %v1117_v30 = vpack.c.bf16 %v868_v29, %v868_v29  ;;  %1237 = vrot.lane.b32.xlu0 %v999_v28, %s3003_s23 }
 0x131   : > { %2650 = vmatmul.mubr.msk.bf16.vlgmr.msra.gmra.mrb[4].mxu1 %vm1008_vm3, %v999_v28 }
 0x132   : > { %1357 = vrot.lane.b32.xlu1 %v1117_v30, %s3003_s23  ;;  %2660 = vmatpush3.bf16.xpose.msra.mxu1 %v1130_v31 }
 0x133   : > { %2661 = vmatprep.mubr.msk.bf16.mxu1 %vm3002_vm1, %v3001_v3  ;;  %2671 = vmatprep.subr.bf16.mxu1 %v3001_v3 }
 0x134   : > { %1479 = vrot.lane.b32.xlu0 %v1000_v19, %s3004_s18 }
 0x136   : > { %1477 = vrot.lane.b32.xlu1 %v999_v28, %s3004_s18 }
 0x138   : > { %1596 = vrot.lane.b32.xlu0 %v1118_v26, %s3004_s18 }
 0x139   : > { %2662 = vmatmul.mubr.msk.bf16.vlgmr.msra.gmra.mrb[8].mxu1 %vm1008_vm3, %v1117_v30 }
 0x13a   : > { %1594 = vrot.lane.b32.xlu1 %v1117_v30, %s3004_s18  ;;  %2673 = vmatprep.mubr.msk.bf16.mxu1 %vm3002_vm1, %v3001_v3 }
 0x13c   : > { %1714 = vrot.lane.b32.xlu0 %v1000_v19, %s3005_s17 }
 0x13e   : > { %1712 = vrot.lane.b32.xlu1 %v999_v28, %s3005_s17 }
 0x140   : > { %1831 = vrot.lane.b32.xlu0 %v1118_v26, %s3005_s17 }
 0x142   : > { %1829 = vrot.lane.b32.xlu1 %v1117_v30, %s3005_s17 }
 0x19b   : > { %v1241_v34 = vpop.permute.xlu0 %1240 }
 0x19c   : > { %v1246_v35 = vsel %vm1008_vm3, %v1241_v34, 0 }
 0x19d   : > { %2672 = vmatpush3.bf16.xpose.msra.mxu1 %v1246_v35  ;;  %v1361_v36 = vpop.permute.xlu1 %1360 }
 0x19e   : > { %2683 = vmatprep.subr.bf16.mxu1 %v3001_v3  ;;  %v1366_v38 = vsel %vm1008_vm3, %v1361_v36, 0 }
 0x1a2   : > { %v1238_v37 = vpop.permute.xlu0 %1237 }
 0x1a4   : > { %2674 = vmatmul.mubr.msk.bf16.vlgmr.msra.gmra.mrb[12].mxu1 %vm1008_vm3, %v1238_v37  ;;  %v1358_v40 = vpop.permute.xlu1 %1357 }
 0x1a5   : > { %2684 = vmatpush3.bf16.xpose.msra.mxu1 %v1366_v38  ;;  %2685 = vmatprep.mubr.msk.bf16.mxu1 %vm3002_vm1, %v3001_v3 }
 0x1a6   : > { %2695 = vmatprep.subr.bf16.mxu1 %v3001_v3  ;;  %v1480_v39 = vpop.permute.xlu0 %1479 }
 0x1a7   : > { %v1485_v41 = vsel %vm1008_vm3, %v1480_v39, 0 }
 0x1a8   : > { %v1478_v43 = vpop.permute.xlu1 %1477 }
 0x1aa   : > { %v1597_v42 = vpop.permute.xlu0 %1596 }
 0x1ab   : > { %v1602_v44 = vsel %vm1008_vm3, %v1597_v42, 0 }
 0x1ac   : > { %2686 = vmatmul.mubr.msk.bf16.vlgmr.msra.gmra.mrb[16].mxu1 %vm1008_vm3, %v1358_v40  ;;  %v1595_v46 = vpop.permute.xlu1 %1594 }
 0x1ad   : > { %2696 = vmatpush3.bf16.xpose.msra.mxu1 %v1485_v41  ;;  %2697 = vmatprep.mubr.msk.bf16.mxu1 %vm3002_vm1, %v3001_v3 }
 0x1ae   : > { %2707 = vmatprep.subr.bf16.mxu1 %v3001_v3  ;;  %v1715_v45 = vpop.permute.xlu0 %1714 }
 0x1af   : > { %v1720_v47 = vsel %vm1008_vm3, %v1715_v45, 0 }
 0x1b0   : > { %v1713_v49 = vpop.permute.xlu1 %1712 }
 0x1b2   : > { %v1832_v48 = vpop.permute.xlu0 %1831 }
 0x1b3   : > { %v1837_v50 = vsel %vm1008_vm3, %v1832_v48, 0 }
 0x1b4   : > { %2698 = vmatmul.mubr.msk.bf16.vlgmr.msra.gmra.mrb[20].mxu1 %vm1008_vm3, %v1478_v43  ;;  %v1830_v51 = vpop.permute.xlu1 %1829 }
 0x1b5   : > { %2708 = vmatpush3.bf16.xpose.msra.mxu1 %v1602_v44  ;;  %2709 = vmatprep.mubr.msk.bf16.mxu1 %vm3002_vm1, %v3001_v3 }
 0x1b6   : > { %2719 = vmatprep.subr.bf16.mxu1 %v3001_v3 }
 0x1bc   : > { %2710 = vmatmul.mubr.msk.bf16.vlgmr.msra.gmra.mrb[24].mxu1 %vm1008_vm3, %v1595_v46 }
 0x1bd   : > { %2720 = vmatpush3.bf16.xpose.msra.mxu1 %v1720_v47  ;;  %2721 = vmatprep.mubr.msk.bf16.mxu1 %vm3002_vm1, %v3001_v3 }
 0x1be   : > { %2731 = vmatprep.subr.bf16.mxu1 %v3001_v3 }
 0x1c4   : > { %2722 = vmatmul.mubr.msk.bf16.vlgmr.msra.gmra.mrb[28].mxu1 %vm1008_vm3, %v1713_v49 }
 0x1c5   : > { %2732 = vmatpush3.bf16.xpose.msra.mxu1 %v1837_v50  ;;  %2733 = vmatprep.mubr.msk.bf16.mxu1 %vm3002_vm1, %v3001_v3 }
 0x1c6   : > { %2743 = vmatprep.subr.bf16.mxu1 %v3001_v3 }
 0x1cc   : > { %2734 = vmatmul.mubr.msk.bf16.vlgmr.msra.gmra.mrb[32].mxu1 %vm1008_vm3, %v1830_v51  ;;  %v2521_v51 = vld [vmem:[%s3674_s20] ss:$0 sm:$0xff] }
 0x1cd   : > { %2747 = vmatprep.mubr.msk.bf16.mxu1 %vm3002_vm1, %v3001_v3 }
 0x204   : > { %v1049_v53 = vpop.f32.mrb[4].mxu1 }
 0x205   : > { %v1050_v54 = vadd.f32 %v2525_v52, %v1049_v53  ;;  %v2651_v55 = vpop.f32.mrb[5].mxu1 }
 0x206   : > { %v1052_v56 = vpop.f32.mrb[6].mxu1 }
 0x207   : > { %v2652_v57 = vpop.f32.mrb[7].mxu1  ;;  %v1055_v58 = vsel %vm1008_vm3, %v1050_v54, -inf }
 0x208   : > { %1056 = vmax.xlane.f32.xlu0 %v1055_v58 }
 0x20c   : > { %v1166_v60 = vpop.f32.mrb[8].mxu1 }
 0x20d   : > { %v1167_v61 = vadd.f32 %v2528_v59, %v1166_v60  ;;  %v2663_v62 = vpop.f32.mrb[9].mxu1 }
 0x20e   : > { %v1169_v63 = vpop.f32.mrb[10].mxu1 }
 0x20f   : > { %v2664_v0 = vpop.f32.mrb[11].mxu1  ;;  %v1172_v1 = vsel %vm1008_vm3, %v1167_v61, -inf }
 0x210   : > { %1173 = vmax.xlane.f32.xlu1 %v1172_v1 }
 0x277   : > { %v1282_v2 = vpop.f32.mrb[12].mxu1 }
 0x278   : > { %v3347_v4 = vadd.f32 %v2525_v52, %v1282_v2  ;;  %v2675_v5 = vpop.f32.mrb[13].mxu1 }
 0x279   : > { %v1285_v6 = vpop.f32.mrb[14].mxu1 }
 0x27a   : > { %v2676_v9 = vpop.f32.mrb[15].mxu1  ;;  %v1288_v10 = vsel %vm1008_vm3, %v3347_v4, -inf }
 0x27b   : > { %1289 = vmax.xlane.f32.xlu0 %v1288_v10 }
 0x27f   : > { %v1402_v11 = vpop.f32.mrb[16].mxu1 }
 0x280   : > { %v3351_v12 = vadd.f32 %v2528_v59, %v1402_v11  ;;  %v2687_v13 = vpop.f32.mrb[17].mxu1 }
 0x281   : > { %v1405_v14 = vpop.f32.mrb[18].mxu1 }
 0x282   : > { %v2688_v15 = vpop.f32.mrb[19].mxu1  ;;  %v1408_v16 = vsel %vm1008_vm3, %v3351_v12, -inf }
 0x283   : > { %1409 = vmax.xlane.f32.xlu0 %v1408_v16 }
 0x287   : > { %v1521_v17 = vpop.f32.mrb[20].mxu1 }
 0x288   : > { %v3355_v18 = vadd.f32 %v2525_v52, %v1521_v17  ;;  %v2699_v19 = vpop.f32.mrb[21].mxu1 }
 0x289   : > { %v1524_v20 = vpop.f32.mrb[22].mxu1 }
 0x28a   : > { %v2700_v21 = vpop.f32.mrb[23].mxu1  ;;  %v1527_v22 = vsel %vm1008_vm3, %v3355_v18, -inf }
 0x28b   : > { %1528 = vmax.xlane.f32.xlu1 %v1527_v22 }
 0x28f   : > { %v1638_v23 = vpop.f32.mrb[24].mxu1 }
 0x290   : > { %v3359_v24 = vadd.f32 %v2528_v59, %v1638_v23  ;;  %v2711_v25 = vpop.f32.mrb[25].mxu1 }
 0x291   : > { %v1641_v26 = vpop.f32.mrb[26].mxu1 }
 0x292   : > { %v2712_v27 = vpop.f32.mrb[27].mxu1  ;;  %v1644_v28 = vsel %vm1008_vm3, %v3359_v24, -inf }
 0x293   : > { %1645 = vmax.xlane.f32.xlu0 %v1644_v28 }
 0x295   : > { %v1057_v29 = vpop.xlane.xlu0 %1056 }
 0x296   : > { %v1058_v30 = vsub.f32 %v1050_v54, %v1057_v29 }
 0x297   : > { %v1756_v31 = vpop.f32.mrb[28].mxu1 }
 0x298   : > { %v1059_v32 = vmul.f32 1.442695, %v1058_v30  ;;  %v3363_v33 = vadd.f32 %v2525_v52, %v1756_v31  ;;  %v2723_v34 = vpop.f32.mrb[29].mxu1  ;;  %v990_v52 = vpop.f32.mrb[4].mxu0 }
 0x299   : > { %v1759_v35 = vpop.f32.mrb[30].mxu1  ;;  %v991_v53 = vadd.f32 %v2521_v51, %v990_v52  ;;  %v2645_v54 = vpop.f32.mrb[5].mxu0 }
 0x29a   : > { %2865 = vpow2.f32 %v1059_v32  ;;  %v2724_v36 = vpop.f32.mrb[31].mxu1  ;;  %v1762_v37 = vsel %vm1008_vm3, %v3363_v33, -inf  ;;  %v993_v55 = vpop.f32.mrb[6].mxu0 }
 0x29b   : > { %1763 = vmax.xlane.f32.xlu1 %v1762_v37  ;;  %v994_v56 = vadd.f32 %v2521_v51, %v993_v55  ;;  %v2646_v57 = vpop.f32.mrb[7].mxu0  ;;  %v3378_v58 = vpack.c.bf16 %v991_v53, %v991_v53 }
 0x29d   : > { %v1174_v38 = vpop.xlane.xlu1 %1173  ;;  %v1119_v17 = vpack.c.bf16 %v994_v56, %v994_v56 }
 0x29e   : > { %v1175_v39 = vsub.f32 %v1167_v61, %v1174_v38 }
 0x29f   : > { %v1873_v40 = vpop.f32.mrb[32].mxu1  ;;  %v1188_v25 = vsel %vm1070_vm4, %v1119_v17, 0 }
 0x2a0   : > { %v1176_v41 = vmul.f32 1.442695, %v1175_v39  ;;  %v3367_v42 = vadd.f32 %v2528_v59, %v1873_v40  ;;  %v2735_v43 = vpop.f32.mrb[33].mxu1  ;;  %v1072_v59 = vsel %vm1070_vm4, %v3378_v58, 0 }
 0x2a1   : > { %v1876_v44 = vpop.f32.mrb[34].mxu1  ;;  %2654 = vmatpush3.bf16.msra.mxu0 %v1072_v59 }
 0x2a2   : > { %2867 = vpow2.f32 %v1176_v41  ;;  %v2736_v45 = vpop.f32.mrb[35].mxu1  ;;  %v1879_v46 = vsel %vm1008_vm3, %v3367_v42, -inf  ;;  %2665 = vmatprep.subr.bf16.mxu0 %v3001_v3 }
 0x2a3   : > { %1880 = vmax.xlane.f32.xlu0 %v1879_v46 }
 0x2a4   : > { %v2866_v47 = vpop.eup %2865 }
 0x2a5   : > { %v1061_v48 = vsel %vm1008_vm3, %v2866_v47, 0.0 }
 0x2a6   : > { %1062 = vadd.xlane.f32.xlu1 %v1061_v48 }
 0x2ac   : > { %v2868_v49 = vpop.eup %2867 }
 0x2ad   : > { %v1178_v50 = vsel %vm1008_vm3, %v2868_v49, 0.0 }
 0x2ae   : > { %1179 = vadd.xlane.f32.xlu0 %v1178_v50 }
 0x308   : > { %v1290_v60 = vpop.xlane.xlu0 %1289 }
 0x309   : > { %v1291_v61 = vsub.f32 %v3347_v4, %v1290_v60 }
 0x30b   : > { %v1292_v62 = vmul.f32 1.442695, %v1291_v61 }
 0x30d   : > { %2869 = vpow2.f32 %v1292_v62 }
 0x310   : > { %v1410_v63 = vpop.xlane.xlu0 %1409 }
 0x311   : > { %v1411_v0 = vsub.f32 %v3351_v12, %v1410_v63 }
 0x313   : > { %v1412_v1 = vmul.f32 1.442695, %v1411_v0 }
 0x315   : > { %2871 = vpow2.f32 %v1412_v1 }
 0x317   : > { %v3385_v2 = vpop.eup %2869 }
 0x318   : > { %v1529_v5 = vpop.xlane.xlu1 %1528  ;;  %v1294_v6 = vsel %vm1008_vm3, %v3385_v2, 0.0 }
 0x319   : > { %v1530_v9 = vsub.f32 %v3355_v18, %v1529_v5  ;;  %1295 = vadd.xlane.f32.xlu1 %v1294_v6 }
 0x31b   : > { %v1531_v10 = vmul.f32 1.442695, %v1530_v9 }
 0x31d   : > { %2873 = vpow2.f32 %v1531_v10 }
 0x31f   : > { %v3390_v11 = vpop.eup %2871 }
 0x320   : > { %v1414_v4 = vsel %vm1008_vm3, %v3390_v11, 0.0  ;;  %v1646_v15 = vpop.xlane.xlu0 %1645 }
 0x321   : > { %1415 = vadd.xlane.f32.xlu0 %v1414_v4  ;;  %v1647_v22 = vsub.f32 %v3359_v24, %v1646_v15 }
 0x323   : > { %v1648_v26 = vmul.f32 1.442695, %v1647_v22 }
 0x327   : > { %v3394_v12 = vpop.eup %2873 }
 0x328   : > { %v1533_v13 = vsel %vm1008_vm3, %v3394_v12, 0.0  ;;  %v1764_v14 = vpop.xlane.xlu1 %1763 }
 0x329   : > { %1534 = vadd.xlane.f32.xlu1 %v1533_v13  ;;  %v1765_v27 = vsub.f32 %v3363_v33, %v1764_v14 }
 0x32b   : > { %v1766_v30 = vmul.f32 1.442695, %v1765_v27 }
 0x330   : > { %v1881_v18 = vpop.xlane.xlu0 %1880 }
 0x331   : > { %v1882_v24 = vsub.f32 %v3367_v42, %v1881_v18 }
 0x333   : > { %v1063_v16 = vpop.xlane.xlu1 %1062  ;;  %v1883_v32 = vmul.f32 1.442695, %v1882_v24 }
 0x334   : > { %2875 = vrcp.f32 %v1063_v16 }
 0x337   : > { %1421 = vrot.lane.b32.xlu0 %v1119_v17, %s3003_s23 }
 0x33a   : > { %1301 = vrot.lane.b32.xlu1 %v3378_v58, %s3003_s23 }
 0x33b   : > { %v1180_v19 = vpop.xlane.xlu0 %1179 }
 0x33c   : > { %2877 = vrcp.f32 %v1180_v19 }
 0x33d   : > { %2879 = vpow2.f32 %v1648_v26 }
 0x33e   : > { %v2876_v20 = vpop.eup %2875  ;;  %2881 = vpow2.f32 %v1766_v30 }
 0x33f   : > { %v1065_v21 = vmul.f32 %v2876_v20, %v2866_v47  ;;  %2883 = vpow2.f32 %v1883_v32 }
 0x341   : > { %v1066_v23 = vpack.c.bf16 %v1065_v21, %v1065_v21 }
 0x343   : > { %2656 = vmatmul.mubr.msk.bf16.vlgmr.msra.gmra.mrb[8].mxu0 %vm1008_vm3, %v1066_v23 }
 0x344   : > { %2666 = vmatpush3.bf16.msra.mxu0 %v1188_v25  ;;  %2667 = vmatprep.mubr.msk.bf16.mxu0 %vm3002_vm1, %v3001_v3 }
 0x345   : > { %2677 = vmatprep.subr.bf16.mxu0 %v3001_v3 }
 0x346   : > { %v2878_v28 = vpop.eup %2877 }
 0x347   : > { %v1182_v29 = vmul.f32 %v2878_v28, %v2868_v49  ;;  %v2880_v33 = vpop.eup %2879 }
 0x348   : > { %v1650_v34 = vsel %vm1008_vm3, %v2880_v33, 0.0  ;;  %v3413_v35 = vpop.eup %2881 }
 0x349   : > { %v1183_v31 = vpack.c.bf16 %v1182_v29, %v1182_v29  ;;  %v1768_v36 = vsel %vm1008_vm3, %v3413_v35, 0.0  ;;  %v3417_v37 = vpop.eup %2883 }
 0x34a   : > { %v1885_v38 = vsel %vm1008_vm3, %v3417_v37, 0.0 }
 0x34b   : > { %2668 = vmatmul.mubr.msk.bf16.vlgmr.msra.gmra.mrb[12].mxu0 %vm1008_vm3, %v1183_v31 }
 0x34c   : > { %2679 = vmatprep.mubr.msk.bf16.mxu0 %vm3002_vm1, %v3001_v3 }
 0x356   : > { %1651 = vadd.xlane.f32.xlu0 %v1650_v34 }
 0x35a   : > { %1769 = vadd.xlane.f32.xlu0 %v1768_v36 }
 0x35e   : > { %1886 = vadd.xlane.f32.xlu1 %v1885_v38 }
 0x370   : > { %1539 = vrot.lane.b32.xlu0 %v3378_v58, %s3004_s18 }
 0x374   : > { %1656 = vrot.lane.b32.xlu0 %v1119_v17, %s3004_s18 }
 0x378   : > { %1774 = vrot.lane.b32.xlu0 %v3378_v58, %s3005_s17 }
 0x37c   : > { %1891 = vrot.lane.b32.xlu0 %v1119_v17, %s3005_s17 }
 0x3a6   : > { %v1296_v39 = vpop.xlane.xlu1 %1295 }
 0x3a7   : > { %2885 = vrcp.f32 %v1296_v39 }
 0x3ae   : > { %v1416_v40 = vpop.xlane.xlu0 %1415 }
 0x3af   : > { %2887 = vrcp.f32 %v1416_v40 }
 0x3b1   : > { %v2886_v41 = vpop.eup %2885 }
 0x3b2   : > { %v1298_v43 = vmul.f32 %v2886_v41, %v3385_v2  ;;  %v1422_v46 = vpop.permute.xlu0 %1421 }
 0x3b3   : > { %v1427_v49 = vsel %vm1070_vm4, %v1422_v46, 0 }
 0x3b4   : > { %v1299_v47 = vpack.c.bf16 %v1298_v43, %v1298_v43 }
 0x3b6   : > { %v1535_v42 = vpop.xlane.xlu1 %1534 }
 0x3b7   : > { %2889 = vrcp.f32 %v1535_v42 }
 0x3b9   : > { %v2888_v48 = vpop.eup %2887 }
 0x3ba   : > { %v1302_v44 = vpop.permute.xlu1 %1301  ;;  %v1418_v50 = vmul.f32 %v2888_v48, %v3390_v11  ;;  %v2857_v48 = vld [vmem:[%s3210_s25] sm:$0xff]  }
 0x3bb   : > { %v1307_v45 = vsel %vm1070_vm4, %v1302_v44, 0  ;;  %2744 = vmatpush3.bf16.msra.mxu1 %v2857_v48  ;;  %v2549_v48 = vld [vmem:[%s776_s2] ss:$0 sm:$0xff]  ;;  %s3680_s2 = sld [smem:[#allocation10_spill]] }
 0x3bc   : > { %2678 = vmatpush3.bf16.msra.mxu0 %v1307_v45  ;;  %v1419_v51 = vpack.c.bf16 %v1418_v50, %v1418_v50  ;;  %2745 = vmatprep.subr.bf16.mxu1 %v3001_v3 }
 0x3bd   : > { %2689 = vmatprep.subr.bf16.mxu0 %v3001_v3 }
 0x3bf   : > { %2680 = vmatmul.mubr.msk.bf16.vlgmr.msra.gmra.mrb[16].mxu0 %vm1008_vm3, %v1299_v47 }
 0x3c0   : > { %2690 = vmatpush3.bf16.msra.mxu0 %v1427_v49  ;;  %2691 = vmatprep.mubr.msk.bf16.mxu0 %vm3002_vm1, %v3001_v3 }
 0x3c1   : > { %2701 = vmatprep.subr.bf16.mxu0 %v3001_v3  ;;  %v2890_v53 = vpop.eup %2889  ;;  %s2570_s22 = sshll.u32 %s3680_s2, 8 }
 0x3c2   : > { %v1537_v55 = vmul.f32 %v2890_v53, %v3394_v12 }
 0x3c4   : > { %v1538_v58 = vpack.c.bf16 %v1537_v55, %v1537_v55 }
 0x3c7   : > { %2692 = vmatmul.mubr.msk.bf16.vlgmr.msra.gmra.mrb[20].mxu0 %vm1008_vm3, %v1419_v51 }
 0x3c8   : > { %2703 = vmatprep.mubr.msk.bf16.mxu0 %vm3002_vm1, %v3001_v3 }
 0x3e3   : > { %v1652_v52 = vpop.xlane.xlu0 %1651 }
 0x3e4   : > { %2891 = vrcp.f32 %v1652_v52  ;;  %v2858_v52 = vld [vmem:[%s3210_s25 + $0x8] sm:$0xff]  }
 0x3e5   : > { %2746 = vmatpush3.bf16.msra.mxu1 %v2858_v52 }
 0x3e6   : > { %2759 = vmatprep.subr.bf16.mxu1 %v3001_v3 }
 0x3e7   : > { %v1770_v54 = vpop.xlane.xlu0 %1769 }
 0x3e8   : > { %2893 = vrcp.f32 %v1770_v54 }
 0x3eb   : > { %v1540_v56 = vpop.permute.xlu0 %1539  ;;  %v1887_v63 = vpop.xlane.xlu1 %1886 }
 0x3ec   : > { %v1545_v57 = vsel %vm1070_vm4, %v1540_v56, 0  ;;  %2895 = vrcp.f32 %v1887_v63 }
 0x3ed   : > { %2702 = vmatpush3.bf16.msra.mxu0 %v1545_v57 }
 0x3ee   : > { %2713 = vmatprep.subr.bf16.mxu0 %v3001_v3  ;;  %v2892_v59 = vpop.eup %2891 }
 0x3ef   : > { %v1657_v60 = vpop.permute.xlu0 %1656  ;;  %v1654_v62 = vmul.f32 %v2892_v59, %v2880_v33 }
 0x3f0   : > { %v1662_v61 = vsel %vm1070_vm4, %v1657_v60, 0  ;;  %2704 = vmatmul.mubr.msk.bf16.vlgmr.msra.gmra.mrb[24].mxu0 %vm1008_vm3, %v1538_v58 }
 0x3f1   : > { %2714 = vmatpush3.bf16.msra.mxu0 %v1662_v61  ;;  %2715 = vmatprep.mubr.msk.bf16.mxu0 %vm3002_vm1, %v3001_v3  ;;  %v1655_v1 = vpack.c.bf16 %v1654_v62, %v1654_v62 }
 0x3f2   : > { %2725 = vmatprep.subr.bf16.mxu0 %v3001_v3  ;;  %v2894_v2 = vpop.eup %2893 }
 0x3f3   : > { %v1775_v0 = vpop.permute.xlu0 %1774  ;;  %v1772_v6 = vmul.f32 %v2894_v2, %v3413_v35 }
 0x3f4   : > { %v1780_v5 = vsel %vm1070_vm4, %v1775_v0, 0 }
 0x3f5   : > { %v1773_v10 = vpack.c.bf16 %v1772_v6, %v1772_v6 }
 0x3f6   : > { %v2896_v11 = vpop.eup %2895 }
 0x3f7   : > { %v1892_v9 = vpop.permute.xlu0 %1891  ;;  %v1889_v12 = vmul.f32 %v2896_v11, %v3417_v37 }
 0x3f8   : > { %2716 = vmatmul.mubr.msk.bf16.vlgmr.msra.gmra.mrb[28].mxu0 %vm1008_vm3, %v1655_v1  ;;  %v1897_v4 = vsel %vm1070_vm4, %v1892_v9, 0 }
 0x3f9   : > { %2726 = vmatpush3.bf16.msra.mxu0 %v1780_v5  ;;  %2727 = vmatprep.mubr.msk.bf16.mxu0 %vm3002_vm1, %v3001_v3  ;;  %v1890_v13 = vpack.c.bf16 %v1889_v12, %v1889_v12  ;;  %v2543_v5 = vld [vmem:[%s3676_s16] ss:$0 sm:$0xff]  ;;  %s2905_s16 = scalar_lea.vmem %s3538_s14, 256 }
 0x3fa   : > { %2737 = vmatprep.subr.bf16.mxu0 %v3001_v3  ;;  %p2906_p1 = scmp.ne.s32.totalorder %s3538_s14, %s2905_s16 }
 0x3fc   : > { %p2907_p2 = pnand %p2906_p1, %p3145_p3 }
 0x3fe   : > { %p2908_p4 = pneg %p2907_p2 }
 0x400   : > { %2728 = vmatmul.mubr.msk.bf16.vlgmr.msra.gmra.mrb[32].mxu0 %vm1008_vm3, %v1773_v10 }
 0x401   : > { %2738 = vmatpush3.bf16.msra.mxu0 %v1897_v4  ;;  %2739 = vmatprep.mubr.msk.bf16.mxu0 %vm3002_vm1, %v3001_v3 }
 0x402   : > { %2751 = vmatprep.subr.bf16.mxu0 %v3001_v3 }
 0x408   : > { %2740 = vmatmul.mubr.msk.bf16.vlgmr.msra.gmra.mrb[36].mxu0 %vm1008_vm3, %v1890_v13 }
 0x409   : > { %2755 = vmatprep.mubr.msk.bf16.mxu0 %vm3002_vm1, %v3001_v3 }
 0x416   : > { %v1108_v14 = vpop.f32.mrb[8].mxu0 }
 0x417   : > { %v1114_v15 = vpack.c.bf16 %v1108_v14, %v1108_v14  ;;  %v2657_v16 = vpop.f32.mrb[9].mxu0 }
 0x418   : > { %v1111_v17 = vpop.f32.mrb[10].mxu0 }
 0x419   : > { %1116 = vst.msk [vmem:[#allocation2] sm:$0xf] %vm1115_vm5, %v1114_v15  ;;  %v2658_v18 = vpop.f32.mrb[11].mxu0 }
 0x41e   : > { %v1224_v19 = vpop.f32.mrb[12].mxu0 }
 0x41f   : > { %v1230_v20 = vpack.c.bf16 %v1224_v19, %v1224_v19  ;;  %v2669_v21 = vpop.f32.mrb[13].mxu0 }
 0x420   : > { %v1227_v22 = vpop.f32.mrb[14].mxu0 }
 0x421   : > { %v1232_v23 = vrot.slane %v1230_v20, 4  ;;  %v2670_v25 = vpop.f32.mrb[15].mxu0 }
 0x423   : > { %1235 = vst.msk [vmem:[#allocation2] sm:$0xf0] %vm1234_vm6, %v1232_v23 }
 0x492   : > { %v1343_v26 = vpop.f32.mrb[16].mxu0 }
 0x493   : > { %v1349_v27 = vpack.c.bf16 %v1343_v26, %v1343_v26  ;;  %v2681_v28 = vpop.f32.mrb[17].mxu0  ;;  %v2859_v26 = vld [vmem:[%s3227_s27] sm:$0xff]  }
 0x494   : > { %v1346_v29 = vpop.f32.mrb[18].mxu0  ;;  %2752 = vmatpush3.bf16.msra.mxu0 %v2859_v26  ;;  %v2861_v28 = vld [vmem:[%s3241_s10] sm:$0xff]  }
 0x495   : > { %1351 = vrot.lane.b32.xlu0 %v1349_v27, %s3006_s15  ;;  %v2682_v30 = vpop.f32.mrb[19].mxu0  ;;  %v2860_v27 = vld [vmem:[%s3227_s27 + $0x8] sm:$0xff]   ;;  %2753 = vmatprep.subr.bf16.mxu0 %v3001_v3  ;;  %s3009_s27 = smov [#allocation3]  }
 0x496   : > { %v2862_v29 = vld [vmem:[%s3241_s10 + $0x8] sm:$0xff]   ;;  %s2909_s21 = sshll.u32 %s3009_s27, 4  ;;  %s2910_s21 = int_to_ptr.vmem [resolvable:$false] %s2909_s21 }
 0x497   : > { %s2911_s24 = scalar_lea.vmem %s2910_s21, 512  ;;  %p2912_p5 = scmp.lt.s32.totalorder %s3538_s14, %s2910_s21 }
 0x498   : > { %2754 = vmatpush3.bf16.msra.mxu0 %v2860_v27  ;;  %p2913_p6 = scmp.lt.s32.totalorder %s2911_s24, %s2905_s16 }
 0x49a   : > { %v1463_v24 = vpop.f32.mrb[20].mxu0  ;;  %p2914_p7 = por %p2913_p6, %p2912_p5 }
 0x49b   : > { %v1469_v31 = vpack.c.bf16 %v1463_v24, %v1463_v24  ;;  %v2693_v32 = vpop.f32.mrb[21].mxu0 }
 0x49c   : > { %v1466_v33 = vpop.f32.mrb[22].mxu0  ;;  %p2915_p8 = pnand %p2914_p7, %p2908_p4 }
 0x49d   : > { %v1471_v34 = vrot.slane %v1469_v31, 4  ;;  %v2694_v35 = vpop.f32.mrb[23].mxu0 }
 0x49f   : > { %1472 = vrot.lane.b32.xlu0 %v1471_v34, %s3006_s15 }
 0x4c3   : > { %v1581_v36 = vpop.f32.mrb[24].mxu0 }
 0x4c4   : > { %v1587_v37 = vpack.c.bf16 %v1581_v36, %v1581_v36  ;;  %v2705_v38 = vpop.f32.mrb[25].mxu0 }
 0x4c5   : > { %v1584_v39 = vpop.f32.mrb[26].mxu0 }
 0x4c6   : > { %1589 = vrot.lane.b32.xlu0 %v1587_v37, %s3007_s26  ;;  %v2706_v40 = vpop.f32.mrb[27].mxu0  ;;  %v3494_v37 = vld [vmem:[%s3678_s28] ss:$0 sm:$0xff] }
 0x4cb   : > { %v1698_v41 = vpop.f32.mrb[28].mxu0 }
 0x4cc   : > { %v1704_v42 = vpack.c.bf16 %v1698_v41, %v1698_v41  ;;  %v2717_v43 = vpop.f32.mrb[29].mxu0  ;;  %v3502_v41 = vld [vmem:[%s768_s4] ss:$0 sm:$0xff] }
 0x4cd   : > { %v1701_v44 = vpop.f32.mrb[30].mxu0 }
 0x4ce   : > { %v1706_v45 = vrot.slane %v1704_v42, 4  ;;  %v2718_v46 = vpop.f32.mrb[31].mxu0 }
 0x4cf   : > { %v2863_v46 = vld [vmem:[%s3241_s10 + $0x10] sm:$0xff]  }
 0x4d0   : > { %1707 = vrot.lane.b32.xlu1 %v1706_v45, %s3007_s26 }
 0x4d3   : > { %v1816_v47 = vpop.f32.mrb[32].mxu0 }
 0x4d4   : > { %v1822_v49 = vpack.c.bf16 %v1816_v47, %v1816_v47  ;;  %v2729_v50 = vpop.f32.mrb[33].mxu0  ;;  %v2864_v47 = vld [vmem:[%s3241_s10 + $0x18] sm:$0xff]  }
 0x4d5   : > { %v1819_v51 = vpop.f32.mrb[34].mxu0 }
 0x4d6   : > { %1824 = vrot.lane.b32.xlu0 %v1822_v49, %s3008_s30  ;;  %v2730_v53 = vpop.f32.mrb[35].mxu0 }
 0x4db   : > { %v1933_v54 = vpop.f32.mrb[36].mxu0 }
 0x4dc   : > { %v1939_v55 = vpack.c.bf16 %v1933_v54, %v1933_v54  ;;  %v2741_v56 = vpop.f32.mrb[37].mxu0 }
 0x4dd   : > { %v1936_v57 = vpop.f32.mrb[38].mxu0 }
 0x4de   : > { %v1941_v58 = vrot.slane %v1939_v55, 4  ;;  %v2742_v59 = vpop.f32.mrb[39].mxu0 }
 0x4e0   : > { %1942 = vrot.lane.b32.xlu0 %v1941_v58, %s3008_s30  ;;  %s3683_s30 = sld [smem:[#allocation31_spill]] }
 0x4e6   : > { %s3533_s25 = scalar_lea.hbm %s3683_s30, %s2570_s22 }
 0x507   : > { %v1352_v60 = vpop.permute.xlu0 %1351 }
 0x508   : > { %1355 = vst.msk [vmem:[#allocation2] sm:$0xf] %vm1354_vm7, %v1352_v60 }
 0x511   : > { %v1473_v61 = vpop.permute.xlu0 %1472 }
 0x512   : > { %1476 = vst.msk [vmem:[#allocation2] sm:$0xf0] %vm1475_vm8, %v1473_v61 }
 0x538   : > { %v1590_v62 = vpop.permute.xlu0 %1589 }
 0x539   : > { %1593 = vst.msk [vmem:[#allocation2] sm:$0xf] %vm1592_vm9, %v1590_v62 }
 0x542   : > { %v1708_v63 = vpop.permute.xlu1 %1707 }
 0x543   : > { %1711 = vst.msk [vmem:[#allocation2] sm:$0xf0] %vm1710_vm10, %v1708_v63 }
 0x548   : > { %v1825_v0 = vpop.permute.xlu0 %1824 }
 0x549   : > { %1828 = vst.msk [vmem:[#allocation2] sm:$0xf] %vm1827_vm11, %v1825_v0 }
 0x552   : > { %v1943_v1 = vpop.permute.xlu0 %1942 }
 0x553   : > { %1946 = vst.msk [vmem:[#allocation2] sm:$0xf0] %vm1945_vm12, %v1943_v1 }
 0x55a   : > { %v1947_v2 = vld [vmem:[#allocation2] sm:$0xff] }
 0x55b   : > { %2748 = vmatmul.mubr.msk.bf16.vlgmr.msra.gmra.mrb[36].mxu1 %vm822_vm2, %v1947_v2 }
 0x55c   : > { %2767 = vmatprep.mubr.msk.bf16.mxu1 %vm3002_vm1, %v3001_v3  ;;  %2760 = vmatpush3.bf16.msra.mxu1 %v2861_v28 }
 0x55d   : > { %2761 = vmatprep.subr.bf16.mxu1 %v3001_v3 }
 0x560   : > { %2762 = vmatpush3.bf16.msra.mxu1 %v2862_v29 }
 0x561   : > { %2763 = vmatprep.subr.bf16.mxu1 %v3001_v3 }
 0x564   : > { %2764 = vmatpush3.bf16.msra.mxu1 %v2863_v46 }
 0x565   : > { %2765 = vmatprep.subr.bf16.mxu1 %v3001_v3  ;;  %v2553_v3 = vld [vmem:[%s784_s9] ss:$0 sm:$0xff]  ;;  %s3681_s9 = sld [smem:[#allocation7_spill]] }
 0x568   : > { %2766 = vmatpush3.bf16.msra.mxu1 %v2864_v47 }
 0x56b   : > { %s3684_s6 = sand.u32 1, %s3681_s9  }
 0x56c   : > { %s3544_s8 = scalar_lea.sflag [#allocation4], %s3684_s6 }
 0x62e   : > { %v2008_v6 = vpop.f32.mrb[36].mxu1 }
 0x62f   : > { %v2009_v9 = vadd.f32 %v2543_v5, %v2008_v6  ;;  %v2749_v10 = vpop.f32.mrb[37].mxu1 }
 0x630   : > { %v2011_v11 = vpop.f32.mrb[38].mxu1 }
 0x631   : > { %v2012_v4 = vadd.f32 %v2543_v5, %v2011_v11  ;;  %v2750_v12 = vpop.f32.mrb[39].mxu1  ;;  %v2017_v13 = vadd.f32 %v2009_v9, %v3257_v7 }
 0x633   : > { %v2019_v14 = vsel %vm822_vm2, %v2017_v13, 0.0  ;;  %v2018_v15 = vadd.f32 %v2012_v4, %v3260_v8 }
 0x634   : > { %2020 = vadd.xlane.f32.xlu0 %v2019_v14 }
 0x635   : > { %v2022_v16 = vsel %vm822_vm2, %v2018_v15, 0.0 }
 0x636   : > { %2023 = vadd.xlane.f32.xlu1 %v2022_v16 }
 0x6c1   : > { %v2021_v17 = vpop.xlane.xlu0 %2020 }
 0x6c2   : > { %v2026_v18 = vmul.f32 0.03125, %v2021_v17 }
 0x6c3   : > { %v2024_v19 = vpop.xlane.xlu1 %2023 }
 0x6c4   : > { %v2028_v20 = vsub.f32 %v2017_v13, %v2026_v18  ;;  %v2027_v21 = vmul.f32 0.03125, %v2024_v19 }
 0x6c6   : > { %v2029_v22 = vsub.f32 %v2018_v15, %v2027_v21  ;;  %v2030_v23 = vmul.f32 %v2028_v20, %v2028_v20 }
 0x6c8   : > { %v2032_v7 = vsel %vm822_vm2, %v2030_v23, 0.0  ;;  %v2031_v25 = vmul.f32 %v2029_v22, %v2029_v22 }
 0x6c9   : > { %2033 = vadd.xlane.f32.xlu0 %v2032_v7 }
 0x6ca   : > { %v2035_v8 = vsel %vm822_vm2, %v2031_v25, 0.0 }
 0x6cd   : > { %2036 = vadd.xlane.f32.xlu0 %v2035_v8 }
 0x756   : > { %v2034_v30 = vpop.xlane.xlu0 %2033 }
 0x757   : > { %v2038_v24 = vmul.f32 0.03125, %v2034_v30 }
 0x759   : > { %v2040_v31 = vadd.f32 1e-05, %v2038_v24 }
 0x75a   : > { %v2037_v32 = vpop.xlane.xlu0 %2036 }
 0x75b   : > { %2897 = vrsqrt.f32 %v2040_v31  ;;  %v2039_v33 = vmul.f32 0.03125, %v2037_v32 }
 0x75d   : > { %v2041_v34 = vadd.f32 1e-05, %v2039_v33 }
 0x75f   : > { %2899 = vrsqrt.f32 %v2041_v34 }
 0x765   : > { %v2898_v35 = vpop.eup %2897 }
 0x766   : > { %v2044_v36 = vmul.f32 %v2898_v35, %v2028_v20 }
 0x768   : > { %v2052_v39 = vmul.f32 %v3494_v37, %v2044_v36 }
 0x769   : > { %v2900_v38 = vpop.eup %2899 }
 0x76a   : > { %v2045_v40 = vmul.f32 %v2900_v38, %v2029_v22  ;;  %v2060_v43 = vadd.f32 %v3502_v41, %v2052_v39 }
 0x76c   : > { %v2053_v42 = vmul.f32 %v3494_v37, %v2045_v40 }
 0x76e   : > { %v2061_v44 = vadd.f32 %v3502_v41, %v2053_v42 }
 0x770   : > { %v2062_v45 = vpack.c.bf16 %v2061_v44, %v2060_v43 }
 0x772   : > { %2756 = vmatmul.mubr.msk.bf16.vlgmr.msra.gmra.mrb[40].mxu0 %vm822_vm2, %v2062_v45 }
 0x845   : > { %v2123_v49 = vpop.f32.mrb[40].mxu0 }
 0x846   : > { %v2124_v50 = vadd.f32 %v2549_v48, %v2123_v49  ;;  %v2757_v51 = vpop.f32.mrb[41].mxu0 }
 0x847   : > { %v2126_v52 = vpop.f32.mrb[42].mxu0 }
 0x848   : > { %v2127_v53 = vadd.f32 %v2549_v48, %v2126_v52  ;;  %v2758_v54 = vpop.f32.mrb[43].mxu0  ;;  %v2130_v55 = vmax.f32 %v2124_v50, 0.0 }
 0x84a   : > { %v2131_v56 = vmax.f32 %v2127_v53, 0.0 }
 0x84c   : > { %v2132_v57 = vpack.c.bf16 %v2131_v56, %v2130_v55 }
 0x84e   : > { %2768 = vmatmul.mubr.msk.bf16.vlgmr.msra.gmra.mrb[40].mxu1 %vm2172_vm13, %v2132_v57 }
 0x921   : > { %v2210_v58 = vpop.f32.mrb[40].mxu1 }
 0x922   : > { %v2211_v59 = vadd.f32 %v2553_v3, %v2210_v58  ;;  %v2769_v60 = vpop.f32.mrb[41].mxu1 }
 0x923   : > { %v2213_v61 = vpop.f32.mrb[42].mxu1 }
 0x924   : > { %v2214_v62 = vadd.f32 %v2553_v3, %v2213_v61  ;;  %v2770_v63 = vpop.f32.mrb[43].mxu1  ;;  %v2217_v0 = vadd.f32 %v2211_v59, %v2060_v43 }
 0x926   : > { %v2219_v1 = vsel %vm822_vm2, %v2217_v0, 0.0  ;;  %v2218_v2 = vadd.f32 %v2214_v62, %v2061_v44 }
 0x927   : > { %2220 = vadd.xlane.f32.xlu0 %v2219_v1 }
 0x928   : > { %v2222_v5 = vsel %vm822_vm2, %v2218_v2, 0.0 }
 0x929   : > { %2223 = vadd.xlane.f32.xlu1 %v2222_v5 }
 0x9b4   : > { %v2221_v6 = vpop.xlane.xlu0 %2220 }
 0x9b5   : > { %v2225_v9 = vmul.f32 0.03125, %v2221_v6 }
 0x9b6   : > { %v2224_v10 = vpop.xlane.xlu1 %2223 }
 0x9b7   : > { %v2227_v11 = vsub.f32 %v2217_v0, %v2225_v9  ;;  %v2226_v4 = vmul.f32 0.03125, %v2224_v10 }
 0x9b9   : > { %v2228_v12 = vsub.f32 %v2218_v2, %v2226_v4  ;;  %v2229_v13 = vmul.f32 %v2227_v11, %v2227_v11 }
 0x9bb   : > { %v2231_v14 = vsel %vm822_vm2, %v2229_v13, 0.0  ;;  %v2230_v15 = vmul.f32 %v2228_v12, %v2228_v12 }
 0x9bc   : > { %2232 = vadd.xlane.f32.xlu0 %v2231_v14 }
 0x9bd   : > { %v2234_v16 = vsel %vm822_vm2, %v2230_v15, 0.0 }
 0x9be   : > { %2235 = vadd.xlane.f32.xlu1 %v2234_v16 }
 0xa49   : > { %v2233_v17 = vpop.xlane.xlu0 %2232 }
 0xa4a   : > { %v2237_v18 = vmul.f32 0.03125, %v2233_v17 }
 0xa4b   : > { %v2236_v19 = vpop.xlane.xlu1 %2235 }
 0xa4c   : > { %v2239_v20 = vadd.f32 1e-05, %v2237_v18  ;;  %v2238_v21 = vmul.f32 0.03125, %v2236_v19 }
 0xa4e   : > { %2901 = vrsqrt.f32 %v2239_v20  ;;  %v2240_v22 = vadd.f32 1e-05, %v2238_v21 }
 0xa50   : > { %2903 = vrsqrt.f32 %v2240_v22 }
 0xa58   : > { %v2902_v23 = vpop.eup %2901 }
 0xa59   : > { %v2243_v7 = vmul.f32 %v2902_v23, %v2227_v11 }
 0xa5a   : > { %v2904_v25 = vpop.eup %2903 }
 0xa5b   : > { %v2245_v8 = vmul.f32 %v3494_v37, %v2243_v7  ;;  %v2244_v26 = vmul.f32 %v2904_v25, %v2228_v12 }
 0xa5d   : > { %v2247_v27 = vadd.f32 %v3502_v41, %v2245_v8  ;;  %v2246_v28 = vmul.f32 %v3494_v37, %v2244_v26 }
 0xa5f   : > { %2249 = vst.msk [vmem:[%s3243_s0] sm:$0xff] %vm822_vm2, %v2247_v27  ;;  %v2248_v29 = vadd.f32 %v3502_v41, %v2246_v28 }
 0xa61   : > { %2250 = vst.msk [vmem:[%s3243_s0 + $0x8] sm:$0xff] %vm822_vm2, %v2248_v29 }
 0xa62   : > { %2918 = shalt.err (!%p2915_p8)
}
 0xa63   : > { %s2919_s0 = scalar_lea.hbm %s3533_s25, 256  ;;  %s2923_s23 = scalar_lea.hbm %s3683_s30, 512 }
 0xa64   : > { %p2920_p10 = scmp.ne.s32.totalorder %s3533_s25, %s2919_s0  ;;  %p2924_p13 = scmp.lt.u32.totalorder %s3533_s25, %s3683_s30 }
 0xa65   : > { %p2925_p0 = scmp.lt.u32.totalorder %s2923_s23, %s2919_s0  ;;  %p2927_p2 = scmp.lt.u32.totalorder %s2919_s0, %s3533_s25 }
 0xa66   : > { %p2921_p11 = pnand %p2920_p10, %p3145_p3 }
 0xa67   : > { %p2926_p1 = por %p2925_p0, %p2924_p13 }
 0xa68   : > { %p2922_p12 = pneg %p2921_p11 }
 0xa69   : > { %p2928_p4 = por %p2927_p2, %p2926_p1 }
 0xa6b   : > { %p2929_p5 = pnand %p2928_p4, %p2922_p12 }
 0xa6d   : > { %2932 = shalt.err (!%p2929_p5)
}
 0xa6e   : > { %s3010_s4 = smov 128  }
 0xa6f   : > { %2771 = dma.vmem_to_hbm [thread:$0]  (%p3145_p3), %s3538_s14, 256, %s3533_s25, %s3544_s8, %s3010_s4, %s3010_s4, %s3006_s15  }
 0xa70 PF: > { %s3685_s1 = sld [smem:[#allocation13_spill]]  ;;  %s3686_s10 = sld [smem:[#allocation6_spill]] }
 0xa76   : > { %p2777_p6 = scmp.ge.s32.totalorder %s3685_s1, 2  ;;  %s2280_s9 = sand.u32 1, %s3686_s10  }
 0xa77   : > { %s2281_s22 = scalar_lea.sflag [#allocation4], %s2280_s9 }
 0xa78   : > { %p2774_p7 = pnand %p2777_p6, %p3155_p9 }
 0xa7a   : > { %2966 = dma.done.wait (!%p2774_p7), %s2281_s22, 256  }
 0xa7b   : > { %2968 = vsyncadd (!%p2774_p7), %s2281_s22, 4294967040  ;;  %s29_s28 = sadd.s32 1, %s3685_s1   ;;  %s3688_s21 = sld [smem:[#allocation7_spill]] }
 0xa7c   : > { %p26_p8 = scmp.ge.s32.totalorder %s29_s28, 6   ;;  %s3689_s22 = sld [smem:[#allocation8_spill]] }
 0xa7d   : > { %s3690_s23 = sld [smem:[#allocation18_spill]]  ;;  %s3691_s24 = sld [smem:[#allocation11_spill]] }
 0xa7e   : > { %s3692_s25 = sld [smem:[#allocation12_spill]]  ;;  %s3693_s26 = sld [smem:[#allocation14_spill]] }
 0xa7f   : > { %s3694_s27 = sld [smem:[#allocation16_spill]]  ;;  %28 = sbr.rel (!%p26_p8) target bundleno = 17 (0x11), region = 168 }
 0xa86   :  { %2286 = vsyncpa [#allocation4], 1 }
 0xa87   :  { %2288 = vsyncpa [#allocation4 + $0x1], 1 }

</bundles_post_ra>
